<compile_context>
chip_gen: v6e
topology: v6e:2x2x1
jax: 0.10.0
libtpu: 0.0.40
codegen_flags: <defaults>
</compile_context>

<pallas_src>
import jax
import jax.numpy as jnp
from jax.experimental import pallas as pl
from jax.experimental.pallas import tpu as pltpu

# ---- synthetic problem sizes (small, consistent with the module) ------------
N_NODE = 32          # args.n_node
F_IN = 16            # input feature dim
HEADS = 2            # attention heads
HEAD_DIM = 16        # per-head channels
HIDDEN = HEADS * HEAD_DIM   # 32
N_CLASS = 4
N_EDGE = 64
ALPHA = 0.5          # args.alpha

_VMEM = pl.BlockSpec(memory_space=pltpu.MemorySpace.VMEM)


# ---------------------------------------------------------------------------
# Single fused kernel: model forward + masked CE + both attention losses.
# Everything (a few tens of KB) lives in VMEM; outputs are three scalars.
# ---------------------------------------------------------------------------
def _fused_learner_kernel(x_ref, w1_ref, w2_ref, wc_ref, ai_ref, aj_ref,
                          y1h_ref, wtrain_ref, sel_dst_ref, sel_src_ref,
                          y_edge_ref, w_edge_ref,
                          ce_ref, att1_ref, att2_ref):
    # ---- model forward: dense hot path, 3 chained MXU matmuls -------------
    # TODO(synk): the real (external) SGGSR model also does edge-wise message
    # passing over dropout_adj(main_view); its definition is not available, so
    # only the dense matmul hot path is implemented here.
    x = x_ref[...]
    h1 = jnp.maximum(jnp.dot(x, w1_ref[...],
                             preferred_element_type=jnp.float32), 0.0)
    h2 = jnp.maximum(jnp.dot(h1, w2_ref[...],
                             preferred_element_type=jnp.float32), 0.0)
    logit = jnp.dot(h2, wc_ref[...], preferred_element_type=jnp.float32)

    # ---- masked softmax cross-entropy, reduced to a scalar in-kernel ------
    m = jnp.max(logit, axis=-1, keepdims=True)
    z = logit - m
    lse = jnp.log(jnp.sum(jnp.exp(z), axis=-1, keepdims=True))
    nll = -jnp.sum((z - lse) * y1h_ref[...], axis=-1, keepdims=True)   # [N,1]
    ce_ref[...] = jnp.sum(nll * wtrain_ref[...], axis=0, keepdims=True)  # [1,1]

    # ---- GAT-style attention-logit + BCE-with-logits attention loss -------
    # sel_dst/sel_src are one-hot [2E, N] selection matrices, so the edge
    # gathers emb[dst]/emb[src] become MXU matmuls.  The six degree-bucket
    # masked means (hh twice) are pre-folded into w_edge, so each embedding
    # needs only one weighted reduction.
    sel_dst = sel_dst_ref[...]            # [2E, N]
    sel_src = sel_src_ref[...]            # [2E, N]
    ai = ai_ref[...]                      # [1, HIDDEN]
    aj = aj_ref[...]                      # [1, HIDDEN]
    y_e = y_edge_ref[...]                 # [2E, 1]  (1 for pos, 0 for neg)
    w_e = w_edge_ref[...]                 # [2E, 1]  (folded bucket weights)

    def att_loss(emb):
        xi = jnp.dot(sel_dst, emb, preferred_element_type=jnp.float32)  # emb[dst]
        xj = jnp.dot(sel_src, emb, preferred_element_type=jnp.float32)  # emb[src]
        # mean over heads of per-head logits == flattened dot / HEADS
        l = jnp.sum(xi * ai + xj * aj, axis=-1, keepdims=True) * (1.0 / HEADS)
        # numerically-stable binary_cross_entropy_with_logits
        bce = jnp.maximum(l, 0.0) - l * y_e + jnp.log1p(jnp.exp(-jnp.abs(l)))
        return jnp.sum(bce * w_e, axis=0, keepdims=True)                # [1,1]

    att1_ref[...] = att_loss(h1)
    att2_ref[...] = att_loss(h2)


def fused_learner_losses(x, w1, w2, wc, att_i, att_j, y1h, wtrain,
                         sel_dst, sel_src, y_edge, w_edge):
    return pl.pallas_call(
        _fused_learner_kernel,
        out_shape=(jax.ShapeDtypeStruct((1, 1), jnp.float32),   # ce loss
                   jax.ShapeDtypeStruct((1, 1), jnp.float32),   # att loss (out1)
                   jax.ShapeDtypeStruct((1, 1), jnp.float32)),  # att loss (out2)
        in_specs=[_VMEM] * 12,
        out_specs=(_VMEM, _VMEM, _VMEM),
    )(x, w1, w2, wc, att_i, att_j, y1h, wtrain, sel_dst, sel_src, y_edge, w_edge)


# ---------------------------------------------------------------------------
# learner.forward : degree / quantile / binning glue stays in plain JAX,
# everything else is the single fused Pallas kernel above.
# ---------------------------------------------------------------------------
def learner_forward(params, x, edge_index, y, train_mask, neg_key):
    src, dst = edge_index[0], edge_index[1]

    # degree + quantile binning (tiny scalar glue -> plain JAX scatter-add)
    deg = jnp.zeros((N_NODE,), jnp.float32).at[src].add(1.0)
    deg_q1 = jnp.quantile(deg, 1.0 / 3.0)
    deg_q2 = jnp.quantile(deg, 2.0 / 3.0)
    src_degree, dst_degree = deg[src], deg[dst]
    low_s, low_d = src_degree <= deg_q1, dst_degree <= deg_q1
    mid_s = (deg_q1 < src_degree) & (deg_q2 >= src_degree)
    mid_d = (deg_q1 < dst_degree) & (deg_q2 >= dst_degree)
    high_s, high_d = src_degree > deg_q2, dst_degree > deg_q2

    low_low = low_s & low_d
    mid_mid = mid_s & mid_d
    high_high = high_s & high_d
    low_mid = (low_s & mid_d) | (mid_s & low_d)
    low_high = (low_s & high_d) | (high_s & low_d)
    mid_high = (mid_s & high_d) | (high_s & mid_d)

    # TODO(synk): dropout_adj (random edge dropping) is a no-op here because
    # the synthetic model forward does not consume the edge index.
    # TODO(synk): deterministic stand-in for model.negative_sampling.
    neg = jax.random.randint(neg_key, (2, N_EDGE), 0, N_NODE)
    nsrc, ndst = neg[0], neg[1]

    # one-hot selection matrices for x_i = emb[dst_all], x_j = emb[src_all]
    dst_all = jnp.concatenate([dst, ndst])
    src_all = jnp.concatenate([src, nsrc])
    sel_dst = jax.nn.one_hot(dst_all, N_NODE, dtype=jnp.float32)   # [2E, N]
    sel_src = jax.nn.one_hot(src_all, N_NODE, dtype=jnp.float32)   # [2E, N]
    y_edge = jnp.concatenate([jnp.ones((N_EDGE,), jnp.float32),
                              jnp.zeros((N_EDGE,), jnp.float32)]).reshape(-1, 1)

    # Fold the six degree-bucket masked means into one per-edge weight vector.
    # NOTE: high_high is weighted 2x, matching the reference implementation.
    masks = (low_low, mid_mid, high_high, low_mid, low_high, mid_high)
    coeffs = (1.0, 1.0, 2.0, 1.0, 1.0, 1.0)
    w_pos = jnp.zeros((N_EDGE,), jnp.float32)
    for mask, c in zip(masks, coeffs):
        mf = mask.astype(jnp.float32)
        cnt = 2.0 * jnp.sum(mf)          # mask applies to pos + matching neg edges
        w_pos = w_pos + jnp.where(cnt > 0, c / jnp.maximum(cnt, 1.0), 0.0) * mf
    w_edge = jnp.concatenate([w_pos, w_pos]).reshape(-1, 1)        # [2E, 1]

    # train-mask -> normalized per-node CE weight
    tm = train_mask.astype(jnp.float32)
    wtrain = (tm / jnp.maximum(jnp.sum(tm), 1.0)).reshape(-1, 1)   # [N, 1]
    y1h = jax.nn.one_hot(y, N_CLASS, dtype=jnp.float32)            # [N, C]

    ce, att1, att2 = fused_learner_losses(
        x, params["w1"], params["w2"], params["wc"],
        params["att_i"], params["att_j"],
        y1h, wtrain, sel_dst, sel_src, y_edge, w_edge)

    cost = ce[0, 0] + (att1[0, 0] + att2[0, 0]) * ALPHA
    # TODO(synk): cost.backward() + AdamW optimizer.step() are training-state
    # mutations with no forward-kernel equivalent; the forward cost is returned.
    return cost


if __name__ == "__main__":
    key = jax.random.PRNGKey(0)
    (k_x, k_e, k_y, k_m, k_w1, k_w2, k_wc, k_ai, k_aj, k_neg) = jax.random.split(key, 10)

    x = jax.random.normal(k_x, (N_NODE, F_IN), jnp.float32)
    edge_index = jax.random.randint(k_e, (2, N_EDGE), 0, N_NODE)
    y = jax.random.randint(k_y, (N_NODE,), 0, N_CLASS)
    train_mask = jax.random.bernoulli(k_m, 0.5, (N_NODE,))

    params = {
        "w1": 0.1 * jax.random.normal(k_w1, (F_IN, HIDDEN), jnp.float32),
        "w2": 0.1 * jax.random.normal(k_w2, (HIDDEN, HIDDEN), jnp.float32),
        "wc": 0.1 * jax.random.normal(k_wc, (HIDDEN, N_CLASS), jnp.float32),
        "att_i": 0.1 * jax.random.normal(k_ai, (1, HIDDEN), jnp.float32),
        "att_j": 0.1 * jax.random.normal(k_aj, (1, HIDDEN), jnp.float32),
    }

    fwd = jax.jit(learner_forward)
    cost = fwd(params, x, edge_index, y, train_mask, k_neg)
    cost = jax.block_until_ready(cost)
    assert jnp.isfinite(cost), cost
    print("KERNEL_OK")
</pallas_src>

<mosaic_0001>
module attributes {stable_mosaic.version = 11 : i64} {
  func.func private @main(%arg0: i32) attributes {dimension_semantics = [#tpu.dimension_semantics<core_parallel>], iteration_bounds = array<i64: 2>, tpu.core_type = #tpu.core_type<sc_scalar_subcore>, window_params = []} {
    return
  }
}

module attributes {stable_mosaic.version = 11 : i64} {
  func.func private @main(%arg0: i32) attributes {dimension_semantics = [#tpu.dimension_semantics<core_parallel>], iteration_bounds = array<i64: 2>, tpu.core_type = #tpu.core_type<sc_scalar_subcore>, window_params = []} {
    return
  }
}

module attributes {stable_mosaic.version = 11 : i64} {
  func.func @_fused_learner_kernel(%arg0: memref<32x16xf32, #tpu.memory_space<vmem>>, %arg1: memref<16x32xf32, #tpu.memory_space<vmem>>, %arg2: memref<32x32xf32, #tpu.memory_space<vmem>>, %arg3: memref<32x4xf32, #tpu.memory_space<vmem>>, %arg4: memref<1x32xf32, #tpu.memory_space<vmem>>, %arg5: memref<1x32xf32, #tpu.memory_space<vmem>>, %arg6: memref<32x4xf32, #tpu.memory_space<vmem>>, %arg7: memref<32x1xf32, #tpu.memory_space<vmem>>, %arg8: memref<128x32xf32, #tpu.memory_space<vmem>>, %arg9: memref<128x32xf32, #tpu.memory_space<vmem>>, %arg10: memref<128x1xf32, #tpu.memory_space<vmem>>, %arg11: memref<128x1xf32, #tpu.memory_space<vmem>>, %arg12: memref<1x1xf32, #tpu.memory_space<vmem>>, %arg13: memref<1x1xf32, #tpu.memory_space<vmem>>, %arg14: memref<1x1xf32, #tpu.memory_space<vmem>>) attributes {dimension_semantics = [], scalar_prefetch = 0 : i64, scratch_operands = 0 : i64, tpu.core_type = #tpu.core_type<tc>} {
    %c0 = arith.constant 0 : index
    %c0_0 = arith.constant 0 : index
    %0 = vector.load %arg0[%c0, %c0_0] : memref<32x16xf32, #tpu.memory_space<vmem>>, vector<32x16xf32>
    %c0_1 = arith.constant 0 : index
    %c0_2 = arith.constant 0 : index
    %1 = vector.load %arg1[%c0_1, %c0_2] : memref<16x32xf32, #tpu.memory_space<vmem>>, vector<16x32xf32>
    %cst = arith.constant dense<0.000000e+00> : vector<32x32xf32>
    %2 = tpu.matmul %0, %1, %cst {dimension_numbers = #tpu.dot_dimension_numbers<[1], [0], [0], [1], [0, 0, 1, 1], [], []>} : vector<32x16xf32>, vector<16x32xf32>, vector<32x32xf32> -> vector<32x32xf32>
    %cst_3 = arith.constant 0.000000e+00 : f32
    %3 = vector.broadcast %cst_3 : f32 to vector<32x32xf32>
    %4 = arith.maximumf %2, %3 : vector<32x32xf32>
    %c0_4 = arith.constant 0 : index
    %c0_5 = arith.constant 0 : index
    %5 = vector.load %arg2[%c0_4, %c0_5] : memref<32x32xf32, #tpu.memory_space<vmem>>, vector<32x32xf32>
    %cst_6 = arith.constant dense<0.000000e+00> : vector<32x32xf32>
    %6 = tpu.matmul %4, %5, %cst_6 {dimension_numbers = #tpu.dot_dimension_numbers<[1], [0], [0], [1], [0, 0, 1, 1], [], []>} : vector<32x32xf32>, vector<32x32xf32>, vector<32x32xf32> -> vector<32x32xf32>
    %cst_7 = arith.constant 0.000000e+00 : f32
    %7 = vector.broadcast %cst_7 : f32 to vector<32x32xf32>
    %8 = arith.maximumf %6, %7 : vector<32x32xf32>
    %c0_8 = arith.constant 0 : index
    %c0_9 = arith.constant 0 : index
    %9 = vector.load %arg3[%c0_8, %c0_9] : memref<32x4xf32, #tpu.memory_space<vmem>>, vector<32x4xf32>
    %cst_10 = arith.constant dense<0.000000e+00> : vector<32x4xf32>
    %10 = tpu.matmul %8, %9, %cst_10 {dimension_numbers = #tpu.dot_dimension_numbers<[1], [0], [0], [1], [0, 0, 1, 1], [], []>} : vector<32x32xf32>, vector<32x4xf32>, vector<32x4xf32> -> vector<32x4xf32>
    %cst_11 = arith.constant dense<0xFF800000> : vector<32xf32>
    %11 = vector.multi_reduction <maximumf>, %10, %cst_11 [1] : vector<32x4xf32> to vector<32xf32>
    %12 = vector.shape_cast %11 : vector<32xf32> to vector<32x1xf32>
    %13 = vector.broadcast %12 : vector<32x1xf32> to vector<32x4xf32>
    %14 = arith.subf %10, %13 : vector<32x4xf32>
    %15 = math.exp %14 : vector<32x4xf32>
    %cst_12 = arith.constant dense<0.000000e+00> : vector<32xf32>
    %16 = vector.multi_reduction <add>, %15, %cst_12 [1] : vector<32x4xf32> to vector<32xf32>
    %17 = vector.shape_cast %16 : vector<32xf32> to vector<32x1xf32>
    %18 = math.log %17 : vector<32x1xf32>
    %19 = vector.broadcast %18 : vector<32x1xf32> to vector<32x4xf32>
    %20 = arith.subf %14, %19 : vector<32x4xf32>
    %c0_13 = arith.constant 0 : index
    %c0_14 = arith.constant 0 : index
    %21 = vector.load %arg6[%c0_13, %c0_14] : memref<32x4xf32, #tpu.memory_space<vmem>>, vector<32x4xf32>
    %22 = arith.mulf %20, %21 : vector<32x4xf32>
    %cst_15 = arith.constant dense<0.000000e+00> : vector<32xf32>
    %23 = vector.multi_reduction <add>, %22, %cst_15 [1] : vector<32x4xf32> to vector<32xf32>
    %24 = vector.shape_cast %23 : vector<32xf32> to vector<32x1xf32>
    %cst_16 = arith.constant 0.000000e+00 : f32
    %25 = vector.broadcast %cst_16 : f32 to vector<32x1xf32>
    %26 = arith.subf %25, %24 : vector<32x1xf32>
    %c0_17 = arith.constant 0 : index
    %c0_18 = arith.constant 0 : index
    %27 = vector.load %arg7[%c0_17, %c0_18] : memref<32x1xf32, #tpu.memory_space<vmem>>, vector<32x1xf32>
    %28 = arith.mulf %26, %27 : vector<32x1xf32>
    %cst_19 = arith.constant dense<0.000000e+00> : vector<1xf32>
    %29 = vector.multi_reduction <add>, %28, %cst_19 [0] : vector<32x1xf32> to vector<1xf32>
    %30 = vector.shape_cast %29 : vector<1xf32> to vector<1x1xf32>
    %c0_20 = arith.constant 0 : index
    %c0_21 = arith.constant 0 : index
    %31 = vector.load %arg12[%c0_20, %c0_21] : memref<1x1xf32, #tpu.memory_space<vmem>>, vector<1x1xf32>
    tpu.vector_store %arg12[%c0_20, %c0_21], %30 {strides = array<i32>} : memref<1x1xf32, #tpu.memory_space<vmem>>, vector<1x1xf32>,
    %c0_22 = arith.constant 0 : index
    %c0_23 = arith.constant 0 : index
    %32 = vector.load %arg8[%c0_22, %c0_23] : memref<128x32xf32, #tpu.memory_space<vmem>>, vector<128x32xf32>
    %c0_24 = arith.constant 0 : index
    %c0_25 = arith.constant 0 : index
    %33 = vector.load %arg9[%c0_24, %c0_25] : memref<128x32xf32, #tpu.memory_space<vmem>>, vector<128x32xf32>
    %c0_26 = arith.constant 0 : index
    %c0_27 = arith.constant 0 : index
    %34 = vector.load %arg4[%c0_26, %c0_27] : memref<1x32xf32, #tpu.memory_space<vmem>>, vector<1x32xf32>
    %c0_28 = arith.constant 0 : index
    %c0_29 = arith.constant 0 : index
    %35 = vector.load %arg5[%c0_28, %c0_29] : memref<1x32xf32, #tpu.memory_space<vmem>>, vector<1x32xf32>
    %c0_30 = arith.constant 0 : index
    %c0_31 = arith.constant 0 : index
    %36 = vector.load %arg10[%c0_30, %c0_31] : memref<128x1xf32, #tpu.memory_space<vmem>>, vector<128x1xf32>
    %c0_32 = arith.constant 0 : index
    %c0_33 = arith.constant 0 : index
    %37 = vector.load %arg11[%c0_32, %c0_33] : memref<128x1xf32, #tpu.memory_space<vmem>>, vector<128x1xf32>
    %cst_34 = arith.constant dense<0.000000e+00> : vector<128x32xf32>
    %38 = tpu.matmul %32, %4, %cst_34 {dimension_numbers = #tpu.dot_dimension_numbers<[1], [0], [0], [1], [0, 0, 1, 1], [], []>} : vector<128x32xf32>, vector<32x32xf32>, vector<128x32xf32> -> vector<128x32xf32>
    %cst_35 = arith.constant dense<0.000000e+00> : vector<128x32xf32>
    %39 = tpu.matmul %33, %4, %cst_35 {dimension_numbers = #tpu.dot_dimension_numbers<[1], [0], [0], [1], [0, 0, 1, 1], [], []>} : vector<128x32xf32>, vector<32x32xf32>, vector<128x32xf32> -> vector<128x32xf32>
    %40 = vector.broadcast %34 : vector<1x32xf32> to vector<128x32xf32>
    %41 = arith.mulf %38, %40 : vector<128x32xf32>
    %42 = vector.broadcast %35 : vector<1x32xf32> to vector<128x32xf32>
    %43 = arith.mulf %39, %42 : vector<128x32xf32>
    %44 = arith.addf %41, %43 : vector<128x32xf32>
    %cst_36 = arith.constant dense<0.000000e+00> : vector<128xf32>
    %45 = vector.multi_reduction <add>, %44, %cst_36 [1] : vector<128x32xf32> to vector<128xf32>
    %46 = vector.shape_cast %45 : vector<128xf32> to vector<128x1xf32>
    %cst_37 = arith.constant 5.000000e-01 : f32
    %47 = vector.broadcast %cst_37 : f32 to vector<128x1xf32>
    %48 = arith.mulf %46, %47 : vector<128x1xf32>
    %cst_38 = arith.constant 0.000000e+00 : f32
    %49 = vector.broadcast %cst_38 : f32 to vector<128x1xf32>
    %50 = arith.maximumf %48, %49 : vector<128x1xf32>
    %51 = arith.mulf %48, %36 : vector<128x1xf32>
    %52 = arith.subf %50, %51 : vector<128x1xf32>
    %53 = math.absf %48 : vector<128x1xf32>
    %cst_39 = arith.constant 0.000000e+00 : f32
    %54 = vector.broadcast %cst_39 : f32 to vector<128x1xf32>
    %55 = arith.subf %54, %53 : vector<128x1xf32>
    %56 = math.exp %55 : vector<128x1xf32>
    %57 = math.log1p %56 : vector<128x1xf32>
    %58 = arith.addf %52, %57 : vector<128x1xf32>
    %59 = arith.mulf %58, %37 : vector<128x1xf32>
    %cst_40 = arith.constant dense<0.000000e+00> : vector<1xf32>
    %60 = vector.multi_reduction <add>, %59, %cst_40 [0] : vector<128x1xf32> to vector<1xf32>
    %61 = vector.shape_cast %60 : vector<1xf32> to vector<1x1xf32>
    %c0_41 = arith.constant 0 : index
    %c0_42 = arith.constant 0 : index
    %62 = vector.load %arg13[%c0_41, %c0_42] : memref<1x1xf32, #tpu.memory_space<vmem>>, vector<1x1xf32>
    tpu.vector_store %arg13[%c0_41, %c0_42], %61 {strides = array<i32>} : memref<1x1xf32, #tpu.memory_space<vmem>>, vector<1x1xf32>,
    %cst_43 = arith.constant dense<0.000000e+00> : vector<128x32xf32>
    %63 = tpu.matmul %32, %8, %cst_43 {dimension_numbers = #tpu.dot_dimension_numbers<[1], [0], [0], [1], [0, 0, 1, 1], [], []>} : vector<128x32xf32>, vector<32x32xf32>, vector<128x32xf32> -> vector<128x32xf32>
    %cst_44 = arith.constant dense<0.000000e+00> : vector<128x32xf32>
    %64 = tpu.matmul %33, %8, %cst_44 {dimension_numbers = #tpu.dot_dimension_numbers<[1], [0], [0], [1], [0, 0, 1, 1], [], []>} : vector<128x32xf32>, vector<32x32xf32>, vector<128x32xf32> -> vector<128x32xf32>
    %65 = vector.broadcast %34 : vector<1x32xf32> to vector<128x32xf32>
    %66 = arith.mulf %63, %65 : vector<128x32xf32>
    %67 = vector.broadcast %35 : vector<1x32xf32> to vector<128x32xf32>
    %68 = arith.mulf %64, %67 : vector<128x32xf32>
    %69 = arith.addf %66, %68 : vector<128x32xf32>
    %cst_45 = arith.constant dense<0.000000e+00> : vector<128xf32>
    %70 = vector.multi_reduction <add>, %69, %cst_45 [1] : vector<128x32xf32> to vector<128xf32>
    %71 = vector.shape_cast %70 : vector<128xf32> to vector<128x1xf32>
    %cst_46 = arith.constant 5.000000e-01 : f32
    %72 = vector.broadcast %cst_46 : f32 to vector<128x1xf32>
    %73 = arith.mulf %71, %72 : vector<128x1xf32>
    %cst_47 = arith.constant 0.000000e+00 : f32
    %74 = vector.broadcast %cst_47 : f32 to vector<128x1xf32>
    %75 = arith.maximumf %73, %74 : vector<128x1xf32>
    %76 = arith.mulf %73, %36 : vector<128x1xf32>
    %77 = arith.subf %75, %76 : vector<128x1xf32>
    %78 = math.absf %73 : vector<128x1xf32>
    %cst_48 = arith.constant 0.000000e+00 : f32
    %79 = vector.broadcast %cst_48 : f32 to vector<128x1xf32>
    %80 = arith.subf %79, %78 : vector<128x1xf32>
    %81 = math.exp %80 : vector<128x1xf32>
    %82 = math.log1p %81 : vector<128x1xf32>
    %83 = arith.addf %77, %82 : vector<128x1xf32>
    %84 = arith.mulf %83, %37 : vector<128x1xf32>
    %cst_49 = arith.constant dense<0.000000e+00> : vector<1xf32>
    %85 = vector.multi_reduction <add>, %84, %cst_49 [0] : vector<128x1xf32> to vector<1xf32>
    %86 = vector.shape_cast %85 : vector<1xf32> to vector<1x1xf32>
    %c0_50 = arith.constant 0 : index
    %c0_51 = arith.constant 0 : index
    %87 = vector.load %arg14[%c0_50, %c0_51] : memref<1x1xf32, #tpu.memory_space<vmem>>, vector<1x1xf32>
    tpu.vector_store %arg14[%c0_50, %c0_51], %86 {strides = array<i32>} : memref<1x1xf32, #tpu.memory_space<vmem>>, vector<1x1xf32>,
    return
  }
}

</mosaic_0001>

<bundles_post_ra>
// kernel: learner_forward.1
= control target key start
LH: loop header
LB: loop body
LE: loop exit
PB: predicated region body
PF: predicated region fallthrough
CT: control target
= control target key end

     0   :  { %20 = vsyncpa [#allocation3], 0  ;;  %vm52_vm0 = vcmask 130048   ;;  %s4104_s0 = inlined_call_operand.vmem [shape: f32[32,16], index: 0, kind: input, shape index: {}]   ;;  %s4105_s1 = inlined_call_operand.vmem [shape: f32[16,32], index: 1, kind: input, shape index: {}]   ;;  %s4106_s2 = inlined_call_operand.vmem [shape: f32[32,32], index: 2, kind: input, shape index: {}]   ;;  %s4107_s3 = inlined_call_operand.vmem [shape: f32[32,4], index: 3, kind: input, shape index: {}]   ;;  %s4108_s4 = inlined_call_operand.vmem [shape: f32[1,32], index: 4, kind: input, shape index: {}]   ;;  %s4109_s5 = inlined_call_operand.vmem [shape: f32[1,32], index: 5, kind: input, shape index: {}]   ;;  %s4110_s6 = inlined_call_operand.vmem [shape: f32[32,4], index: 6, kind: input, shape index: {}]   ;;  %s4111_s7 = inlined_call_operand.vmem [shape: f32[32,1], index: 7, kind: input, shape index: {}]   ;;  %s4112_s8 = inlined_call_operand.vmem [shape: f32[128,32], index: 8, kind: input, shape index: {}]   ;;  %s4113_s9 = inlined_call_operand.vmem [shape: f32[128,32], index: 9, kind: input, shape index: {}]   ;;  %s4114_s10 = inlined_call_operand.vmem [shape: f32[128,1], index: 10, kind: input, shape index: {}]   ;;  %s4115_s11 = inlined_call_operand.vmem [shape: f32[128,1], index: 11, kind: input, shape index: {}]   ;;  %s4116_s12 = inlined_call_operand.hbm [shape: f32[1,1], index: 12, kind: output, shape index: {0}]   ;;  %s4117_s13 = inlined_call_operand.hbm [shape: f32[1,1], index: 13, kind: output, shape index: {1}]   ;;  %s4118_s14 = inlined_call_operand.hbm [shape: f32[1,1], index: 14, kind: output, shape index: {2}]  }
   0x1   :  { %v51_v0 = vld [vmem:[%s4105_s1 + $0x8] sm:$0xff]  ;;  %v50_v1 = vld [vmem:[%s4105_s1] sm:$0xff]  ;;  %v157_v4 = vld [vmem:[%s4106_s2 + $0x18] sm:$0xff] }
   0x2   :  { %v46_v2 = vld [vmem:[%s4104_s0] sm:$0xff]  ;;  %2309 = vmatprep.subr.mxu0 %v51_v0  ;;  %v47_v3 = vld [vmem:[%s4104_s0 + $0x8] sm:$0xff]  ;;  %v263_v5 = vld [vmem:[%s4107_s3 + $0x18] sm:$0xff] }
   0x3   :  { %2313 = vmatprep.mubr.msk.f32.mxu0 %vm52_vm0, %v46_v2  ;;  %2310 = vmatpush3.msra.mxu0 %v51_v0 }
   0x4   :  { %21 = vsyncpa [#allocation5], 0  ;;  %2311 = vmatprep.subr.mxu0 %v50_v1  ;;  %v48_v6 = vld [vmem:[%s4104_s0 + $0x10] sm:$0xff]  ;;  %2319 = vmatprep.subr.mxu1 %v157_v4  ;;  %v49_v7 = vld [vmem:[%s4104_s0 + $0x18] sm:$0xff]  ;;  %vm158_vm1 = vcmask 261120   ;;  %vm361_vm2 = vcmask 31744  }
   0x5   :  { %2312 = vmatpush3.msra.mxu0 %v50_v1  ;;  %2320 = vmatpush3.msra.mxu1 %v157_v4  ;;  %v156_v8 = vld [vmem:[%s4106_s2 + $0x10] sm:$0xff]  ;;  %v155_v10 = vld [vmem:[%s4106_s2 + $0x8] sm:$0xff]  ;;  %v154_v12 = vld [vmem:[%s4106_s2] sm:$0xff]  ;;  %vm442_vm5 = vcmask 7168  }
   0x6   :  { %2314 = vmatmul.mubr.msk.f32.vlgmr.msra.gmra.mxu0 %vm52_vm0, %v47_v3  ;;  %2333 = vmatprep.subr.mxu0 %v263_v5  ;;  %v262_v9 = vld [vmem:[%s4107_s3 + $0x10] sm:$0xff]  ;;  %v261_v11 = vld [vmem:[%s4107_s3 + $0x8] sm:$0xff]  ;;  %v260_v13 = vld [vmem:[%s4107_s3] sm:$0xff] }
   0x7   :  { %2316 = vmatprep.mubr.msk.f32.mxu0 %vm52_vm0, %v48_v6  ;;  %2334 = vmatpush3.msra.mxu0 %v263_v5  ;;  %v458_v22 = vld [vmem:[%s4112_s8] sm:$0xff]  ;;  %v2831_v23 = vld [vmem:[%s4112_s8 + $0x8] sm:$0xff]  ;;  %v2838_v24 = vld [vmem:[%s4112_s8 + $0x10] sm:$0xff] }
   0x8   :  { %2321 = vmatprep.subr.mxu1 %v156_v8  ;;  %2335 = vmatprep.subr.mxu0 %v262_v9  ;;  %v2843_v25 = vld [vmem:[%s4112_s8 + $0x18] sm:$0xff]  ;;  %v2850_v26 = vld [vmem:[%s4112_s8 + $0x20] sm:$0xff]  ;;  %v2859_v27 = vld [vmem:[%s4112_s8 + $0x28] sm:$0xff] }
   0x9   :  { %2322 = vmatpush3.msra.mxu1 %v156_v8  ;;  %2336 = vmatpush3.msra.mxu0 %v262_v9  ;;  %v2864_v28 = vld [vmem:[%s4112_s8 + $0x30] sm:$0xff]  ;;  %v2873_v29 = vld [vmem:[%s4112_s8 + $0x38] sm:$0xff]  ;;  %v2878_v30 = vld [vmem:[%s4112_s8 + $0x40] sm:$0xff] }
   0xa   :  { %2317 = vmatmul.mubr.msk.f32.gmra.mxu0 %vm52_vm0, %v49_v7  ;;  %2323 = vmatprep.subr.mxu1 %v155_v10  ;;  %v2887_v31 = vld [vmem:[%s4112_s8 + $0x48] sm:$0xff]  ;;  %v2892_v32 = vld [vmem:[%s4112_s8 + $0x50] sm:$0xff]  ;;  %v2901_v33 = vld [vmem:[%s4112_s8 + $0x58] sm:$0xff] }
   0xb   :  { %2324 = vmatpush3.msra.mxu1 %v155_v10  ;;  %2337 = vmatprep.subr.mxu0 %v261_v11  ;;  %v2906_v34 = vld [vmem:[%s4112_s8 + $0x60] sm:$0xff]  ;;  %v2915_v35 = vld [vmem:[%s4112_s8 + $0x68] sm:$0xff]  ;;  %v2920_v36 = vld [vmem:[%s4112_s8 + $0x70] sm:$0xff] }
   0xc   :  { %2325 = vmatprep.subr.mxu1 %v154_v12  ;;  %2338 = vmatpush3.msra.mxu0 %v261_v11  ;;  %v2929_v37 = vld [vmem:[%s4112_s8 + $0x78] sm:$0xff]  ;;  %v474_v46 = vld [vmem:[%s4113_s9] sm:$0xff]  ;;  %v475_v47 = vld [vmem:[%s4113_s9 + $0x8] sm:$0xff] }
   0xd   :  { %2326 = vmatpush3.msra.mxu1 %v154_v12  ;;  %2339 = vmatprep.subr.mxu0 %v260_v13  ;;  %v476_v48 = vld [vmem:[%s4113_s9 + $0x10] sm:$0xff]  ;;  %v477_v49 = vld [vmem:[%s4113_s9 + $0x18] sm:$0xff]  ;;  %v478_v50 = vld [vmem:[%s4113_s9 + $0x20] sm:$0xff] }
   0xe   :  { %2340 = vmatpush3.msra.mxu0 %v260_v13  ;;  %v479_v51 = vld [vmem:[%s4113_s9 + $0x28] sm:$0xff]  ;;  %v480_v52 = vld [vmem:[%s4113_s9 + $0x30] sm:$0xff]  ;;  %v481_v53 = vld [vmem:[%s4113_s9 + $0x38] sm:$0xff] }
   0xf   :  { %v482_v54 = vld [vmem:[%s4113_s9 + $0x40] sm:$0xff]  ;;  %v483_v55 = vld [vmem:[%s4113_s9 + $0x48] sm:$0xff]  ;;  %v484_v56 = vld [vmem:[%s4113_s9 + $0x50] sm:$0xff] }
  0x10   :  { %v485_v57 = vld [vmem:[%s4113_s9 + $0x58] sm:$0xff]  ;;  %v486_v58 = vld [vmem:[%s4113_s9 + $0x60] sm:$0xff]  ;;  %v487_v59 = vld [vmem:[%s4113_s9 + $0x68] sm:$0xff] }
  0x11   :  { %v488_v60 = vld [vmem:[%s4113_s9 + $0x70] sm:$0xff]  ;;  %v489_v61 = vld [vmem:[%s4113_s9 + $0x78] sm:$0xff] }
  0xc6   :  { %v2315_v14 = vpop.f32.mrf.mxu0 }
  0xc7   :  { %v2812_v17 = vmax.f32 %v2315_v14, 0.0 }
  0xc8   :  { %v131_v15 = vpop.f32.mrf.mxu0 }
  0xc9   :  { %v2810_v16 = vmax.f32 %v131_v15, 0.0  ;;  %v3069_v15 = vld [vmem:[%s4108_s4] ss:$0 sm:$0xff] }
  0xca   :  { %v2318_v18 = vpop.f32.mrf.mxu0 }
  0xcb   :  { %v153_v19 = vmax.f32 %v2318_v18, 0.0  ;;  %2327 = vmatprep.mubr.msk.f32.mxu1 %vm158_vm1, %v2810_v16  ;;  %v3075_v18 = vld [vmem:[%s4109_s5] ss:$0 sm:$0xff] }
  0xcc   :  { %v141_v20 = vpop.f32.mrf.mxu0  ;;  %2328 = vmatmul.mubr.msk.f32.vlgmr.msra.gmra.mxu1 %vm158_vm1, %v2812_v17 }
  0xcd   :  { %v152_v21 = vmax.f32 %v141_v20, 0.0  ;;  %2347 = vmatprep.subr.mxu1 %v153_v19  ;;  %2379 = vmatprep.subr.mxu0 %v153_v19 }
  0xce   :  { %2348 = vmatpush3.msra.mxu1 %v153_v19 }
  0xcf   :  { %2330 = vmatprep.mubr.msk.f32.mxu1 %vm158_vm1, %v152_v21  ;;  %2349 = vmatprep.subr.mxu1 %v152_v21 }
  0xd0   :  { %2331 = vmatmul.mubr.msk.f32.gmra.mxu1 %vm158_vm1, %v153_v19 }
  0xd1   :  { %2350 = vmatpush3.msra.mxu1 %v152_v21  ;;  %2355 = vmatprep.mubr.msk.f32.mxu1 %vm158_vm1, %v458_v22 }
  0xd2   :  { %2351 = vmatprep.subr.mxu1 %v2812_v17 }
  0xd3   :  { %2352 = vmatpush3.msra.mxu1 %v2812_v17 }
  0xd4   :  { %2353 = vmatprep.subr.mxu1 %v2810_v16 }
  0xd5   :  { %2354 = vmatpush3.msra.mxu1 %v2810_v16 }
  0xd6   :  { %2356 = vmatmul.mubr.msk.f32.vlgmr.msra.gmra.mxu1 %vm158_vm1, %v2831_v23 }
  0xd7   :  { %2358 = vmatprep.mubr.msk.f32.mxu1 %vm158_vm1, %v2838_v24 }
  0xda   :  { %2359 = vmatmul.mubr.msk.f32.gmra.mxu1 %vm158_vm1, %v2843_v25 }
  0xdb   :  { %2361 = vmatprep.mubr.msk.f32.mxu1 %vm158_vm1, %v2850_v26 }
  0xde   :  { %2362 = vmatmul.mubr.msk.f32.gmra.mxu1 %vm158_vm1, %v2859_v27 }
  0xdf   :  { %2364 = vmatprep.mubr.msk.f32.mxu1 %vm158_vm1, %v2864_v28 }
  0xe2   :  { %2365 = vmatmul.mubr.msk.f32.gmra.mxu1 %vm158_vm1, %v2873_v29 }
  0xe3   :  { %2367 = vmatprep.mubr.msk.f32.mxu1 %vm158_vm1, %v2878_v30 }
  0xe6   :  { %2368 = vmatmul.mubr.msk.f32.gmra.mxu1 %vm158_vm1, %v2887_v31 }
  0xe7   :  { %2370 = vmatprep.mubr.msk.f32.mxu1 %vm158_vm1, %v2892_v32 }
  0xea   :  { %2371 = vmatmul.mubr.msk.f32.gmra.mxu1 %vm158_vm1, %v2901_v33 }
  0xeb   :  { %2373 = vmatprep.mubr.msk.f32.mxu1 %vm158_vm1, %v2906_v34 }
  0xee   :  { %2374 = vmatmul.mubr.msk.f32.gmra.mxu1 %vm158_vm1, %v2915_v35 }
  0xef   :  { %2376 = vmatprep.mubr.msk.f32.mxu1 %vm158_vm1, %v2920_v36 }
  0xf2   :  { %2377 = vmatmul.mubr.msk.f32.gmra.mxu1 %vm158_vm1, %v2929_v37 }
  0xf3   :  { %2419 = vmatprep.mubr.msk.f32.mxu1 %vm158_vm1, %v458_v22 }
 0x18c   :  { %v2329_v38 = vpop.f32.mrf.mxu1 }
 0x18d   :  { %v257_v41 = vmax.f32 %v2329_v38, 0.0 }
 0x18e   :  { %v237_v39 = vpop.f32.mrf.mxu1 }
 0x18f   :  { %v256_v40 = vmax.f32 %v237_v39, 0.0 }
 0x190   :  { %v2332_v42 = vpop.f32.mrf.mxu1 }
 0x191   :  { %v259_v43 = vmax.f32 %v2332_v42, 0.0  ;;  %2341 = vmatprep.mubr.msk.f32.mxu0 %vm158_vm1, %v256_v40 }
 0x192   :  { %v247_v44 = vpop.f32.mrf.mxu1  ;;  %2342 = vmatmul.mubr.msk.f32.vlgmr.msra.gmra.mxu0 %vm158_vm1, %v257_v41 }
 0x193   :  { %v258_v45 = vmax.f32 %v247_v44, 0.0  ;;  %2380 = vmatpush3.msra.mxu0 %v153_v19  ;;  %2411 = vmatprep.subr.mxu1 %v259_v43 }
 0x194   :  { %2381 = vmatprep.subr.mxu0 %v152_v21  ;;  %2412 = vmatpush3.msra.mxu1 %v259_v43 }
 0x195   :  { %2382 = vmatpush3.msra.mxu0 %v152_v21  ;;  %2344 = vmatprep.mubr.msk.f32.mxu0 %vm158_vm1, %v258_v45 }
 0x196   :  { %2383 = vmatprep.subr.mxu0 %v2812_v17  ;;  %2413 = vmatprep.subr.mxu1 %v258_v45  ;;  %v2357_v62 = vpop.f32.mrf.mxu1 }
 0x197   :  { %2345 = vmatmul.mubr.msk.f32.gmra.mxu0 %vm158_vm1, %v259_v43  ;;  %2414 = vmatpush3.msra.mxu1 %v258_v45 }
 0x198   :  { %2384 = vmatpush3.msra.mxu0 %v2812_v17  ;;  %2415 = vmatprep.subr.mxu1 %v257_v41  ;;  %v638_v63 = vpop.f32.mrf.mxu1  ;;  %v917_v17 = vmul.f32 %v2357_v62, %v3069_v15 }
 0x199   :  { %2385 = vmatprep.subr.mxu0 %v2810_v16  ;;  %2416 = vmatpush3.msra.mxu1 %v257_v41  ;;  %v916_v21 = vmul.f32 %v3069_v15, %v638_v63 }
 0x19a   :  { %2386 = vmatpush3.msra.mxu0 %v2810_v16  ;;  %2387 = vmatprep.mubr.msk.f32.mxu0 %vm158_vm1, %v474_v46  ;;  %v2360_v0 = vpop.f32.mrf.mxu1 }
 0x19b   :  { %2417 = vmatprep.subr.mxu1 %v256_v40  ;;  %2443 = vmatprep.subr.mxu0 %v259_v43 }
 0x19c   :  { %2388 = vmatmul.mubr.msk.f32.vlgmr.msra.gmra.mxu0 %vm158_vm1, %v475_v47  ;;  %2418 = vmatpush3.msra.mxu1 %v256_v40  ;;  %v648_v1 = vpop.f32.mrf.mxu1 }
 0x19d   :  { %2444 = vmatpush3.msra.mxu0 %v259_v43  ;;  %2390 = vmatprep.mubr.msk.f32.mxu0 %vm158_vm1, %v476_v48 }
 0x19e   :  { %2445 = vmatprep.subr.mxu0 %v258_v45  ;;  %2420 = vmatmul.mubr.msk.f32.vlgmr.msra.gmra.mxu1 %vm158_vm1, %v2831_v23  ;;  %v2363_v2 = vpop.f32.mrf.mxu1 }
 0x19f   :  { %2446 = vmatpush3.msra.mxu0 %v258_v45  ;;  %2422 = vmatprep.mubr.msk.f32.mxu1 %vm158_vm1, %v2838_v24 }
 0x1a0   :  { %2447 = vmatprep.subr.mxu0 %v257_v41  ;;  %2391 = vmatmul.mubr.msk.f32.gmra.mxu0 %vm158_vm1, %v477_v49  ;;  %v658_v3 = vpop.f32.mrf.mxu1 }
 0x1a1   :  { %2448 = vmatpush3.msra.mxu0 %v257_v41  ;;  %2393 = vmatprep.mubr.msk.f32.mxu0 %vm158_vm1, %v478_v50  ;;  %v920_v41 = vmul.f32 %v3069_v15, %v658_v3 }
 0x1a2   :  { %2449 = vmatprep.subr.mxu0 %v256_v40  ;;  %2423 = vmatmul.mubr.msk.f32.gmra.mxu1 %vm158_vm1, %v2843_v25  ;;  %v2366_v4 = vpop.f32.mrf.mxu1 }
 0x1a3   :  { %2450 = vmatpush3.msra.mxu0 %v256_v40  ;;  %2425 = vmatprep.mubr.msk.f32.mxu1 %vm158_vm1, %v2850_v26  ;;  %v919_v26 = vmul.f32 %v2360_v0, %v3069_v15 }
 0x1a4   :  { %2394 = vmatmul.mubr.msk.f32.gmra.mxu0 %vm158_vm1, %v479_v51  ;;  %v668_v5 = vpop.f32.mrf.mxu1 }
 0x1a5   :  { %2396 = vmatprep.mubr.msk.f32.mxu0 %vm158_vm1, %v480_v52 }
 0x1a6   :  { %2426 = vmatmul.mubr.msk.f32.gmra.mxu1 %vm158_vm1, %v2859_v27  ;;  %v2369_v7 = vpop.f32.mrf.mxu1 }
 0x1a7   :  { %2428 = vmatprep.mubr.msk.f32.mxu1 %vm158_vm1, %v2864_v28 }
 0x1a8   :  { %2397 = vmatmul.mubr.msk.f32.gmra.mxu0 %vm158_vm1, %v481_v53  ;;  %v678_v10 = vpop.f32.mrf.mxu1 }
 0x1a9   :  { %2399 = vmatprep.mubr.msk.f32.mxu0 %vm158_vm1, %v482_v54 }
 0x1aa   :  { %2429 = vmatmul.mubr.msk.f32.gmra.mxu1 %vm158_vm1, %v2873_v29  ;;  %v2372_v16 = vpop.f32.mrf.mxu1 }
 0x1ab   :  { %2431 = vmatprep.mubr.msk.f32.mxu1 %vm158_vm1, %v2878_v30  ;;  %v918_v30 = vmul.f32 %v3069_v15, %v648_v1  ;;  %v927_v1 = vmul.f32 %v2372_v16, %v3069_v15 }
 0x1ac   :  { %2400 = vmatmul.mubr.msk.f32.gmra.mxu0 %vm158_vm1, %v483_v55  ;;  %v688_v24 = vpop.f32.mrf.mxu1 }
 0x1ad   :  { %2402 = vmatprep.mubr.msk.f32.mxu0 %vm158_vm1, %v484_v56 }
 0x1ae   :  { %2432 = vmatmul.mubr.msk.f32.gmra.mxu1 %vm158_vm1, %v2887_v31 }
 0x1af   :  { %2434 = vmatprep.mubr.msk.f32.mxu1 %vm158_vm1, %v2892_v32 }
 0x1b0   :  { %2403 = vmatmul.mubr.msk.f32.gmra.mxu0 %vm158_vm1, %v485_v57 }
 0x1b1   :  { %2405 = vmatprep.mubr.msk.f32.mxu0 %vm158_vm1, %v486_v58 }
 0x1b2   :  { %2435 = vmatmul.mubr.msk.f32.gmra.mxu1 %vm158_vm1, %v2901_v33 }
 0x1b3   :  { %2437 = vmatprep.mubr.msk.f32.mxu1 %vm158_vm1, %v2906_v34  ;;  %v2375_v34 = vpop.f32.mrf.mxu1 }
 0x1b4   :  { %2406 = vmatmul.mubr.msk.f32.gmra.mxu0 %vm158_vm1, %v487_v59 }
 0x1b5   :  { %2408 = vmatprep.mubr.msk.f32.mxu0 %vm158_vm1, %v488_v60  ;;  %v698_v44 = vpop.f32.mrf.mxu1 }
 0x1b6   :  { %2438 = vmatmul.mubr.msk.f32.gmra.mxu1 %vm158_vm1, %v2915_v35 }
 0x1b7   :  { %2440 = vmatprep.mubr.msk.f32.mxu1 %vm158_vm1, %v2920_v36  ;;  %v921_v36 = vmul.f32 %v2363_v2, %v3069_v15 }
 0x1b8   :  { %2409 = vmatmul.mubr.msk.f32.gmra.mxu0 %vm158_vm1, %v489_v61 }
 0x1b9   :  { %2451 = vmatprep.mubr.msk.f32.mxu0 %vm158_vm1, %v474_v46  ;;  %v923_v46 = vmul.f32 %v2366_v4, %v3069_v15 }
 0x1ba   :  { %2441 = vmatmul.mubr.msk.f32.gmra.mxu1 %vm158_vm1, %v2929_v37 }
 0x1bc   :  { %2452 = vmatmul.mubr.msk.f32.vlgmr.msra.gmra.mxu0 %vm158_vm1, %v475_v47 }
 0x1bd   :  { %2454 = vmatprep.mubr.msk.f32.mxu0 %vm158_vm1, %v476_v48 }
 0x1c0   :  { %2455 = vmatmul.mubr.msk.f32.gmra.mxu0 %vm158_vm1, %v477_v49 }
 0x1c1   :  { %2457 = vmatprep.mubr.msk.f32.mxu0 %vm158_vm1, %v478_v50 }
 0x1c4   :  { %2458 = vmatmul.mubr.msk.f32.gmra.mxu0 %vm158_vm1, %v479_v51  ;;  %v922_v51 = vmul.f32 %v3069_v15, %v668_v5  ;;  %v926_v5 = vmul.f32 %v3069_v15, %v688_v24 }
 0x1c5   :  { %2460 = vmatprep.mubr.msk.f32.mxu0 %vm158_vm1, %v480_v52 }
 0x1c8   :  { %2461 = vmatmul.mubr.msk.f32.gmra.mxu0 %vm158_vm1, %v481_v53 }
 0x1c9   :  { %2463 = vmatprep.mubr.msk.f32.mxu0 %vm158_vm1, %v482_v54  ;;  %v2378_v54 = vpop.f32.mrf.mxu1 }
 0x1cb   :  { %v3110_v63 = vpop.f32.mrf.mxu1 }
 0x1cc   :  { %2464 = vmatmul.mubr.msk.f32.gmra.mxu0 %vm158_vm1, %v483_v55 }
 0x1cd   :  { %2466 = vmatprep.mubr.msk.f32.mxu0 %vm158_vm1, %v484_v56  ;;  %v925_v56 = vmul.f32 %v2369_v7, %v3069_v15 }
 0x1d0   :  { %2467 = vmatmul.mubr.msk.f32.gmra.mxu0 %vm158_vm1, %v485_v57 }
 0x1d1   :  { %2469 = vmatprep.mubr.msk.f32.mxu0 %vm158_vm1, %v486_v58 }
 0x1d4   :  { %2470 = vmatmul.mubr.msk.f32.gmra.mxu0 %vm158_vm1, %v487_v59 }
 0x1d5   :  { %2472 = vmatprep.mubr.msk.f32.mxu0 %vm158_vm1, %v488_v60  ;;  %v924_v60 = vmul.f32 %v3069_v15, %v678_v10 }
 0x1d8   :  { %2473 = vmatmul.mubr.msk.f32.gmra.mxu0 %vm158_vm1, %v489_v61 }
 0x252   :  { %v3052_v6 = vpop.f32.mrf.mxu0 }
 0x253   :  { %v365_v13 = vsel %vm361_vm2, %v3052_v6, -inf }
 0x254   :  { %v3054_v8 = vpop.f32.mrf.mxu0 }
 0x255   :  { %v362_v9 = vsel %vm361_vm2, %v3054_v8, -inf }
 0x256   :  { %363 = vmax.xlane.f32.xlu0 %v362_v9 }
 0x257   :  { %v3058_v11 = vpop.f32.mrf.mxu0 }
 0x258   :  { %v371_v22 = vsel %vm361_vm2, %v3058_v11, -inf }
 0x259   :  { %v3060_v12 = vpop.f32.mrf.mxu0 }
 0x25a   :  { %366 = vmax.xlane.f32.xlu0 %v365_v13  ;;  %v368_v14 = vsel %vm361_vm2, %v3060_v12, -inf }
 0x25b   :  { %369 = vmax.xlane.f32.xlu1 %v368_v14  ;;  %v929_v14 = vmul.f32 %v2375_v34, %v3069_v15 }
 0x25c   :  { %v2389_v19 = vpop.f32.mrf.mxu0 }
 0x25d   :  { %v939_v20 = vmul.f32 %v2389_v19, %v3075_v18 }
 0x25e   :  { %v831_v23 = vpop.f32.mrf.mxu0  ;;  %v2421_v10 = vpop.f32.mrf.mxu1 }
 0x25f   :  { %372 = vmax.xlane.f32.xlu1 %v371_v22  ;;  %v938_v25 = vmul.f32 %v3075_v18, %v831_v23  ;;  %v955_v27 = vadd.f32 %v939_v20, %v917_v17  ;;  %v928_v20 = vmul.f32 %v3069_v15, %v698_v44 }
 0x260   :  { %v2392_v28 = vpop.f32.mrf.mxu0  ;;  %v1426_v23 = vpop.f32.mrf.mxu1 }
 0x261   :  { %v941_v29 = vmul.f32 %v2392_v28, %v3075_v18  ;;  %v954_v31 = vadd.f32 %v938_v25, %v916_v21  ;;  %v973_v32 = vsel %vm158_vm1, %v955_v27, 0.0  ;;  %v931_v25 = vmul.f32 %v2378_v54, %v3069_v15 }
 0x262   :  { %v841_v33 = vpop.f32.mrf.mxu0 }
 0x263   :  { %v940_v35 = vmul.f32 %v3075_v18, %v841_v33  ;;  %v970_v37 = vsel %vm158_vm1, %v954_v31, 0.0  ;;  %974 = vadd.xlane.f32.xlu1 %v973_v32  ;;  %v3089_v38 = vadd.f32 %v941_v29, %v919_v26  ;;  %v2424_v31 = vpop.f32.mrf.mxu1  ;;  %v1651_v32 = vmul.f32 %v2421_v10, %v3069_v15 }
 0x264   :  { %971 = vadd.xlane.f32.xlu0 %v970_v37  ;;  %v2395_v39 = vpop.f32.mrf.mxu0 }
 0x265   :  { %v943_v40 = vmul.f32 %v2395_v39, %v3075_v18  ;;  %v956_v42 = vadd.f32 %v940_v35, %v918_v30  ;;  %v1436_v39 = vpop.f32.mrf.mxu1 }
 0x266   :  { %v851_v43 = vpop.f32.mrf.mxu0 }
 0x267   :  { %v942_v45 = vmul.f32 %v3075_v18, %v851_v43  ;;  %v976_v47 = vsel %vm158_vm1, %v956_v42, 0.0  ;;  %v3096_v48 = vadd.f32 %v943_v40, %v921_v36  ;;  %v1650_v36 = vmul.f32 %v3069_v15, %v1426_v23 }
 0x268   :  { %977 = vadd.xlane.f32.xlu0 %v976_v47  ;;  %v2398_v49 = vpop.f32.mrf.mxu0 }
 0x269   :  { %v945_v50 = vmul.f32 %v2398_v49, %v3075_v18  ;;  %v3100_v52 = vadd.f32 %v942_v45, %v920_v41  ;;  %v1653_v41 = vmul.f32 %v2424_v31, %v3069_v15  ;;  %v1652_v45 = vmul.f32 %v3069_v15, %v1436_v39 }
 0x26a   :  { %v861_v53 = vpop.f32.mrf.mxu0 }
 0x26b   :  { %v944_v55 = vmul.f32 %v3075_v18, %v861_v53  ;;  %v3104_v57 = vadd.f32 %v945_v50, %v923_v46 }
 0x26c   :  { %v2401_v58 = vpop.f32.mrf.mxu0 }
 0x26d   :  { %v947_v59 = vmul.f32 %v2401_v58, %v3075_v18  ;;  %v3108_v61 = vadd.f32 %v944_v55, %v922_v51 }
 0x26e   :  { %v871_v62 = vpop.f32.mrf.mxu0 }
 0x26f   :  { %v946_v0 = vmul.f32 %v3075_v18, %v871_v62  ;;  %v3114_v2 = vadd.f32 %v947_v59, %v925_v56 }
 0x270   :  { %v2404_v3 = vpop.f32.mrf.mxu0 }
 0x271   :  { %v949_v4 = vmul.f32 %v2404_v3, %v3075_v18  ;;  %v3118_v7 = vadd.f32 %v946_v0, %v924_v60 }
 0x272   :  { %v881_v9 = vpop.f32.mrf.mxu0 }
 0x273   :  { %v948_v13 = vmul.f32 %v3075_v18, %v881_v9  ;;  %v3122_v17 = vadd.f32 %v949_v4, %v927_v1 }
 0x274   :  { %v2407_v19 = vpop.f32.mrf.mxu0 }
 0x275   :  { %v951_v16 = vmul.f32 %v2407_v19, %v3075_v18  ;;  %v3126_v21 = vadd.f32 %v948_v13, %v926_v5 }
 0x276   :  { %v891_v22 = vpop.f32.mrf.mxu0 }
 0x277   :  { %v950_v24 = vmul.f32 %v3075_v18, %v891_v22  ;;  %v3130_v26 = vadd.f32 %v951_v16, %v929_v14 }
 0x278   :  { %v2410_v27 = vpop.f32.mrf.mxu0 }
 0x279   :  { %v953_v28 = vmul.f32 %v2410_v27, %v3075_v18  ;;  %v3133_v29 = vadd.f32 %v950_v24, %v928_v20 }
 0x27a   :  { %v3135_v30 = vpop.f32.mrf.mxu0 }
 0x27b   :  { %v3138_v33 = vadd.f32 %v953_v28, %v931_v25 }
 0x27c   :  { %v2453_v34 = vpop.f32.mrf.mxu0 }
 0x27d   :  { %v1667_v35 = vmul.f32 %v2453_v34, %v3075_v18 }
 0x27e   :  { %v1571_v37 = vpop.f32.mrf.mxu0 }
 0x27f   :  { %v1666_v40 = vmul.f32 %v3075_v18, %v1571_v37  ;;  %v1683_v42 = vadd.f32 %v1667_v35, %v1651_v32 }
 0x280   :  { %v2456_v43 = vpop.f32.mrf.mxu0 }
 0x281   :  { %v1669_v44 = vmul.f32 %v2456_v43, %v3075_v18  ;;  %v1701_v46 = vsel %vm158_vm1, %v1683_v42, 0.0  ;;  %v1682_v47 = vadd.f32 %v1666_v40, %v1650_v36 }
 0x282   :  { %v1581_v49 = vpop.f32.mrf.mxu0  ;;  %1702 = vadd.xlane.f32.xlu1 %v1701_v46 }
 0x283   :  { %v1668_v50 = vmul.f32 %v3075_v18, %v1581_v49  ;;  %v1698_v51 = vsel %vm158_vm1, %v1682_v47, 0.0  ;;  %v3149_v53 = vadd.f32 %v1669_v44, %v1653_v41  ;;  %v979_v49 = vsel %vm158_vm1, %v3089_v38, 0.0 }
 0x284   :  { %1699 = vadd.xlane.f32.xlu0 %v1698_v51  ;;  %v2459_v24 = vpop.f32.mrf.mxu0 }
 0x285   :  { %v1684_v54 = vadd.f32 %v1668_v50, %v1652_v45 }
 0x286   :  { %v1591_v39 = vpop.f32.mrf.mxu0 }
 0x287   :  { %v1704_v55 = vsel %vm158_vm1, %v1684_v54, 0.0  ;;  %v1670_v44 = vmul.f32 %v3075_v18, %v1591_v39  ;;  %v1671_v54 = vmul.f32 %v2459_v24, %v3075_v18 }
 0x288   :  { %1705 = vadd.xlane.f32.xlu1 %v1704_v55  ;;  %v2462_v47 = vpop.f32.mrf.mxu0 }
 0x2df   :  { %v364_v56 = vpop.xlane.xlu0 %363 }
 0x2e0   :  { %v3153_v58 = vsub.f32 %v3054_v8, %v364_v56 }
 0x2e2   :  { %v378_v59 = vmul.f32 1.442695, %v3153_v58 }
 0x2e3   :  { %v367_v60 = vpop.xlane.xlu0 %366 }
 0x2e4   :  { %2478 = vpow2.f32 %v378_v59  ;;  %v3157_v62 = vsub.f32 %v3052_v6, %v367_v60  ;;  %v370_v0 = vpop.xlane.xlu1 %369  ;;  %v1601_v59 = vpop.f32.mrf.mxu0  ;;  %v982_v60 = vsel %vm158_vm1, %v3100_v52, 0.0  ;;  %v985_v52 = vsel %vm158_vm1, %v3096_v48, 0.0 }
 0x2e5   :  { %v3160_v1 = vsub.f32 %v3060_v12, %v370_v0  ;;  %v1707_v0 = vsel %vm158_vm1, %v3149_v53, 0.0  ;;  %v988_v48 = vsel %vm158_vm1, %v3108_v61, 0.0 }
 0x2e6   :  { %v380_v3 = vmul.f32 1.442695, %v3157_v62 }
 0x2e7   :  { %v382_v4 = vmul.f32 1.442695, %v3160_v1 }
 0x2e8   :  { %2480 = vpow2.f32 %v380_v3  ;;  %v373_v5 = vpop.xlane.xlu1 %372 }
 0x2e9   :  { %2482 = vpow2.f32 %v382_v4  ;;  %v3165_v8 = vsub.f32 %v3058_v11, %v373_v5  ;;  %v2427_v11 = vpop.f32.mrf.mxu1  ;;  %v1672_v4 = vmul.f32 %v3075_v18, %v1601_v59 }
 0x2ea   :  { %v1655_v51 = vmul.f32 %v2427_v11, %v3069_v15 }
 0x2eb   :  { %v384_v9 = vmul.f32 1.442695, %v3165_v8  ;;  %v1446_v37 = vpop.f32.mrf.mxu1 }
 0x2ec   :  { %v975_v10 = vpop.xlane.xlu1 %974  ;;  %v1654_v43 = vmul.f32 %v3069_v15, %v1446_v37  ;;  %v1687_v5 = vadd.f32 %v1671_v54, %v1655_v51 }
 0x2ed   :  { %2484 = vpow2.f32 %v384_v9  ;;  %v972_v6 = vpop.xlane.xlu0 %971  ;;  %v3168_v13 = vmul.f32 0.5, %v975_v10  ;;  %v2430_v46 = vpop.f32.mrf.mxu1 }
 0x2ee   :  { %v3170_v14 = vmul.f32 0.5, %v972_v6  ;;  %v1686_v55 = vadd.f32 %v1670_v44, %v1654_v43  ;;  %v2465_v10 = vpop.f32.mrf.mxu0  ;;  %v991_v43 = vsel %vm158_vm1, %v3104_v57, 0.0 }
 0x2ef   :  { %v1083_v12 = vand.u32 2147483647, %v3168_v13  ;;  %v1456_v56 = vpop.f32.mrf.mxu1  ;;  %v1675_v44 = vmul.f32 %v2465_v10, %v3075_v18 }
 0x2f0   :  { %v1082_v19 = vand.u32 2147483647, %v3170_v14  ;;  %v1710_v38 = vsel %vm158_vm1, %v1686_v55, 0.0  ;;  %v1656_v3 = vmul.f32 %v3069_v15, %v1456_v56  ;;  %v1611_v24 = vpop.f32.mrf.mxu0  ;;  %v1034_v51 = vmax.f32 %v3170_v14, 0.0 }
 0x2f1   :  { %v2479_v16 = vpop.eup %2478  ;;  %v1099_v20 = vsub.f32 0.0, %v1083_v12  ;;  %v978_v22 = vpop.xlane.xlu0 %977 }
 0x2f2   :  { %v386_v23 = vsel %vm361_vm2, %v2479_v16, 0.0  ;;  %v1098_v25 = vsub.f32 0.0, %v1082_v19  ;;  %v3175_v27 = vmul.f32 0.5, %v978_v22  ;;  %v2433_v9 = vpop.f32.mrf.mxu1  ;;  %v1657_v19 = vmul.f32 %v2430_v46, %v3069_v15  ;;  %v2468_v37 = vpop.f32.mrf.mxu0 }
 0x2f3   :  { %387 = vadd.xlane.f32.xlu0 %v386_v23  ;;  %v1116_v28 = vmul.f32 1.442695, %v1099_v20  ;;  %v1673_v16 = vmul.f32 %v2462_v47, %v3075_v18  ;;  %v1713_v22 = vsel %vm158_vm1, %v1687_v5, 0.0  ;;  %v1688_v23 = vadd.f32 %v1672_v4, %v1656_v3  ;;  %v3249_v5 = vld [vmem:[%s4114_s10 + $0x10] sm:$0xff] }
 0x2f4   :  { %v1114_v31 = vmul.f32 1.442695, %v1098_v25  ;;  %v1084_v32 = vand.u32 2147483647, %v3175_v27  ;;  %v1466_v11 = vpop.f32.mrf.mxu1  ;;  %v1035_v47 = vmax.f32 %v3168_v13, 0.0  ;;  %v997_v3 = vsel %vm158_vm1, %v3114_v2, 0.0 }
 0x2f5   :  { %v2481_v34 = vpop.eup %2480  ;;  %2486 = vpow2.f32 %v1116_v28  ;;  %v1658_v28 = vmul.f32 %v3069_v15, %v1466_v11 }
 0x2f6   :  { %v2483_v35 = vpop.eup %2482  ;;  %v389_v36 = vsel %vm361_vm2, %v2481_v34, 0.0  ;;  %2488 = vpow2.f32 %v1114_v31  ;;  %v1100_v40 = vsub.f32 0.0, %v1084_v32  ;;  %v1674_v31 = vmul.f32 %v3075_v18, %v1611_v24 }
 0x2f7   :  { %390 = vadd.xlane.f32.xlu1 %v389_v36  ;;  %v392_v41 = vsel %vm361_vm2, %v2483_v35, 0.0  ;;  %v1689_v32 = vadd.f32 %v1673_v16, %v1657_v19  ;;  %v1716_v35 = vsel %vm158_vm1, %v1688_v23, 0.0  ;;  %v2436_v36 = vpop.f32.mrf.mxu1 }
 0x2f8   :  { %393 = vadd.xlane.f32.xlu0 %v392_v41  ;;  %v1118_v42 = vmul.f32 1.442695, %v1100_v40  ;;  %v3217_v40 = vld [vmem:[%s4114_s10] sm:$0xff]  ;;  %v3223_v41 = vld [vmem:[%s4114_s10 + $0x8] sm:$0xff]  ;;  %v1690_v46 = vadd.f32 %v1674_v31, %v1658_v28 }
 0x2f9   :  { %v1050_v54 = vmul.f32 %v3170_v14, %v3217_v40  ;;  %v1051_v55 = vmul.f32 %v3168_v13, %v3223_v41 }
 0x2fa   :  { %v2485_v45 = vpop.eup %2484  ;;  %2490 = vpow2.f32 %v1118_v42  ;;  %v1659_v42 = vmul.f32 %v2433_v9, %v3069_v15  ;;  %v1722_v14 = vsel %vm158_vm1, %v1690_v46, 0.0 }
 0x2fb   :  { %v395_v50 = vsel %vm361_vm2, %v2485_v45, 0.0  ;;  %v1719_v45 = vsel %vm158_vm1, %v1689_v32, 0.0  ;;  %v1067_v10 = vsub.f32 %v1035_v47, %v1051_v55  ;;  %v1661_v32 = vmul.f32 %v2436_v36, %v3069_v15  ;;  %v3280_v36 = vld [vmem:[%s4115_s11] sm:$0xff] }
 0x2fc   :  { %980 = vadd.xlane.f32.xlu0 %v979_v49  ;;  %396 = vadd.xlane.f32.xlu1 %v395_v50  ;;  %v1476_v49 = vpop.f32.mrf.mxu1  ;;  %v1621_v50 = vpop.f32.mrf.mxu0  ;;  %v1691_v9 = vadd.f32 %v1675_v44, %v1659_v42 }
 0x2fd   :  { %v1660_v13 = vmul.f32 %v3069_v15, %v1476_v49  ;;  %v1676_v4 = vmul.f32 %v3075_v18, %v1621_v50 }
 0x2fe   :  { %v2439_v19 = vpop.f32.mrf.mxu1  ;;  %v2471_v16 = vpop.f32.mrf.mxu0 }
 0x300   :  { %983 = vadd.xlane.f32.xlu0 %v982_v60  ;;  %1708 = vadd.xlane.f32.xlu1 %v1707_v0  ;;  %v994_v0 = vsel %vm158_vm1, %v3118_v7, 0.0  ;;  %v1066_v7 = vsub.f32 %v1034_v51, %v1050_v54  ;;  %v1486_v42 = vpop.f32.mrf.mxu1 }
 0x301   :  { %v1662_v55 = vmul.f32 %v3069_v15, %v1486_v42 }
 0x302   :  { %v3194_v6 = vpop.eup %2486 }
 0x303   :  { %v3196_v12 = vpop.eup %2488  ;;  %v1155_v53 = vadd.f32 1.0, %v3194_v6  ;;  %v1158_v39 = vmul.f32 -0.5, %v3194_v6  ;;  %v1161_v59 = vand.u32 2147483647, %v3194_v6 }
 0x304   :  { %986 = vadd.xlane.f32.xlu0 %v985_v52  ;;  %1711 = vadd.xlane.f32.xlu1 %v1710_v38  ;;  %v1146_v20 = vadd.f32 1.0, %v3196_v12  ;;  %v1149_v61 = vmul.f32 -0.5, %v3196_v12  ;;  %v1152_v38 = vand.u32 2147483647, %v3196_v12 }
 0x305   :  { %2492 = vlog2.f32 %v1155_v53  ;;  %v1159_v57 = vadd.f32 1.0, %v1158_v39  ;;  %vm3253_vm3 = vcmp.lt.f32.partialorder %v1161_v59, 0.0004427343  ;;  %v3271_v39 = vld [vmem:[%s4115_s11 + $0x8] sm:$0xff]  ;;  %v2442_v59 = vpop.f32.mrf.mxu1 }
 0x306   :  { %2494 = vlog2.f32 %v1146_v20  ;;  %v1150_v56 = vadd.f32 1.0, %v1149_v61  ;;  %vm3258_vm4 = vcmp.lt.f32.partialorder %v1152_v38, 0.0004427343  ;;  %v1000_v61 = vsel %vm158_vm1, %v3126_v21, 0.0  ;;  %v3298_v38 = vld [vmem:[%s4115_s11 + $0x10] sm:$0xff] }
 0x307   :  { %v3205_v25 = vpop.eup %2490  ;;  %v1160_v52 = vmul.f32 %v3194_v6, %v1159_v57  ;;  %v1052_v6 = vmul.f32 %v3175_v27, %v3249_v5  ;;  %v1496_v20 = vpop.f32.mrf.mxu1 }
 0x308   :  { %989 = vadd.xlane.f32.xlu0 %v988_v48  ;;  %1714 = vadd.xlane.f32.xlu1 %v1713_v22  ;;  %v1164_v34 = vadd.f32 1.0, %v3205_v25  ;;  %v1167_v60 = vmul.f32 -0.5, %v3205_v25  ;;  %v1151_v2 = vmul.f32 %v3196_v12, %v1150_v56  ;;  %v1036_v22 = vmax.f32 %v3175_v27, 0.0 }
 0x309   :  { %v1170_v28 = vand.u32 2147483647, %v3205_v25  ;;  %v1692_v12 = vadd.f32 %v1676_v4, %v1660_v13 }
 0x30a   :  { %2496 = vlog2.f32 %v1164_v34  ;;  %v1168_v23 = vadd.f32 1.0, %v1167_v60  ;;  %v1677_v34 = vmul.f32 %v2468_v37, %v3075_v18  ;;  %v1068_v49 = vsub.f32 %v1036_v22, %v1052_v6 }
 0x30b   :  { %vm3285_vm6 = vcmp.lt.f32.partialorder %v1170_v28, 0.0004427343  ;;  %v1728_v21 = vsel %vm158_vm1, %v1692_v12, 0.0 }
 0x30c   :  { %992 = vadd.xlane.f32.xlu0 %v991_v43  ;;  %1717 = vadd.xlane.f32.xlu1 %v1716_v35  ;;  %v1725_v35 = vsel %vm158_vm1, %v1691_v9, 0.0  ;;  %v1631_v43 = vpop.f32.mrf.mxu0  ;;  %v1663_v9 = vmul.f32 %v2439_v19, %v3069_v15  ;;  %v1006_v19 = vsel %vm158_vm1, %v3133_v29, 0.0  ;;  %v1665_v29 = vmul.f32 %v2442_v59, %v3069_v15 }
 0x30d   :  { %v1678_v57 = vmul.f32 %v3075_v18, %v1631_v43 }
 0x30e   :  { %v2474_v60 = vpop.f32.mrf.mxu0 }
 0x30f   :  { %v1681_v12 = vmul.f32 %v2474_v60, %v3075_v18 }
 0x310   :  { %995 = vadd.xlane.f32.xlu0 %v994_v0  ;;  %1720 = vadd.xlane.f32.xlu1 %v1719_v45  ;;  %v1169_v45 = vmul.f32 %v3205_v25, %v1168_v23  ;;  %v1693_v25 = vadd.f32 %v1677_v34, %v1661_v32  ;;  %v1641_v22 = vpop.f32.mrf.mxu0  ;;  %v952_v23 = vmul.f32 %v3075_v18, %v3135_v30 }
 0x311   :  { %v1680_v6 = vmul.f32 %v3075_v18, %v1641_v22 }
 0x312   :  { %v2493_v53 = vpop.eup %2492 }
 0x313   :  { %v2495_v11 = vpop.eup %2494  ;;  %v1157_v48 = vmul.f32 0.6931472, %v2493_v53  ;;  %v1694_v53 = vadd.f32 %v1678_v57, %v1662_v55 }
 0x314   :  { %998 = vadd.xlane.f32.xlu0 %v997_v3  ;;  %1723 = vadd.xlane.f32.xlu1 %v1722_v14  ;;  %v1148_v31 = vmul.f32 0.6931472, %v2495_v11  ;;  %v1003_v14 = vsel %vm158_vm1, %v3122_v17, 0.0  ;;  %v930_v17 = vmul.f32 %v3069_v15, %v3110_v63  ;;  %v1009_v63 = vsel %vm158_vm1, %v3130_v26, 0.0 }
 0x315   :  { %v1163_v27 = vsel %vm3253_vm3, %v1160_v52, %v1157_v48  ;;  %v1731_v52 = vsel %vm158_vm1, %v1693_v25, 0.0  ;;  %v1734_v24 = vsel %vm158_vm1, %v1694_v53, 0.0  ;;  %v1664_v48 = vmul.f32 %v3069_v15, %v1496_v20  ;;  %v1703_v15 = vpop.xlane.xlu1 %1702 }
 0x316   :  { %v1154_v37 = vsel %vm3258_vm4, %v1151_v2, %v1148_v31  ;;  %v1291_v44 = vadd.f32 %v1163_v27, %v1067_v10  ;;  %v1679_v10 = vmul.f32 %v2471_v16, %v3075_v18  ;;  %v968_v30 = vadd.f32 %v952_v23, %v930_v17  ;;  %v1700_v18 = vpop.xlane.xlu0 %1699 }
 0x317   :  { %v2497_v46 = vpop.eup %2496  ;;  %v1290_v47 = vadd.f32 %v1154_v37, %v1066_v7  ;;  %v1696_v32 = vadd.f32 %v1680_v6, %v1664_v48  ;;  %v1697_v27 = vadd.f32 %v1681_v12, %v1665_v29  ;;  %v1015_v26 = vsel %vm158_vm1, %v3138_v33, 0.0 }
 0x318   :  { %1001 = vadd.xlane.f32.xlu0 %v1000_v61  ;;  %1726 = vadd.xlane.f32.xlu1 %v1725_v35  ;;  %v1307_v51 = vmul.f32 %v1291_v44, %v3271_v39  ;;  %v1166_v54 = vmul.f32 0.6931472, %v2497_v46  ;;  %v1695_v28 = vadd.f32 %v1679_v10, %v1663_v9  ;;  %v1012_v34 = vsel %vm158_vm1, %v968_v30, 0.0 }
 0x319   :  { %v1306_v56 = vmul.f32 %v1290_v47, %v3280_v36  ;;  %v1740_v35 = vsel %vm158_vm1, %v1696_v32, 0.0  ;;  %v1743_v61 = vsel %vm158_vm1, %v1697_v27, 0.0  ;;  %v1747_v42 = vmul.f32 0.5, %v1703_v15  ;;  %v1706_v37 = vpop.xlane.xlu1 %1705 }
 0x31a   :  { %v1323_v0 = vsel %vm442_vm5, %v1307_v51, 0.0  ;;  %v1172_v3 = vsel %vm3285_vm6, %v1169_v45, %v1166_v54  ;;  %v1737_v31 = vsel %vm158_vm1, %v1695_v28, 0.0  ;;  %v3331_v43 = vmul.f32 0.5, %v1700_v18 }
 0x31b   :  { %v1322_v13 = vsel %vm442_vm5, %v1306_v56, 0.0  ;;  %v1292_v4 = vadd.f32 %v1172_v3, %v1068_v49  ;;  %v1811_v44 = vand.u32 2147483647, %v1747_v42  ;;  %v3333_v45 = vmul.f32 0.5, %v1706_v37 }
 0x31c   :  { %1004 = vadd.xlane.f32.xlu0 %v1003_v14  ;;  %1729 = vadd.xlane.f32.xlu1 %v1728_v21  ;;  %v1324_v7 = vadd.f32 %v1323_v0, %v1322_v13  ;;  %v1810_v46 = vand.u32 2147483647, %v3331_v43  ;;  %v1762_v6 = vmax.f32 %v3331_v43, 0.0  ;;  %v1778_v28 = vmul.f32 %v3331_v43, %v3217_v40  ;;  %v410_v40 = vld [vmem:[%s4110_s6] sm:$0xff] }
 0x31d   :  { %v1308_v2 = vmul.f32 %v1292_v4, %v3298_v38  ;;  %v1827_v47 = vsub.f32 0.0, %v1811_v44  ;;  %v1812_v49 = vand.u32 2147483647, %v3333_v45  ;;  %v1764_v43 = vmax.f32 %v3333_v45, 0.0 }
 0x31e   :  { %v1826_v33 = vsub.f32 0.0, %v1810_v46 }
 0x31f   :  { %v1325_v11 = vsel %vm442_vm5, %v1308_v2, 0.0  ;;  %v1844_v50 = vmul.f32 1.442695, %v1827_v47  ;;  %v1828_v21 = vsub.f32 0.0, %v1812_v49 }
 0x320   :  { %1007 = vadd.xlane.f32.xlu0 %v1006_v19  ;;  %1732 = vadd.xlane.f32.xlu1 %v1731_v52  ;;  %v3316_v16 = vadd.f32 %v1325_v11, %v1324_v7  ;;  %v1842_v51 = vmul.f32 1.442695, %v1826_v33  ;;  %v1763_v19 = vmax.f32 %v1747_v42, 0.0  ;;  %v1779_v11 = vmul.f32 %v1747_v42, %v3223_v41 }
 0x321   :  { %2498 = vpow2.f32 %v1844_v50  ;;  %v1846_v54 = vmul.f32 1.442695, %v1828_v21  ;;  %v1794_v42 = vsub.f32 %v1762_v6, %v1778_v28  ;;  %v412_v6 = vld [vmem:[%s4110_s6 + $0x10] sm:$0xff] }
 0x322   :  { %2500 = vpow2.f32 %v1842_v51  ;;  %v1795_v27 = vsub.f32 %v1763_v19, %v1779_v11  ;;  %v1780_v19 = vmul.f32 %v3333_v45, %v3249_v5 }
 0x323   :  { %2502 = vpow2.f32 %v1846_v54 }
 0x324   :  { %1010 = vadd.xlane.f32.xlu0 %v1009_v63  ;;  %1735 = vadd.xlane.f32.xlu1 %v1734_v24 }
 0x328   :  { %1013 = vadd.xlane.f32.xlu0 %v1012_v34  ;;  %1738 = vadd.xlane.f32.xlu1 %v1737_v31 }
 0x32c   :  { %1016 = vadd.xlane.f32.xlu0 %v1015_v26  ;;  %1741 = vadd.xlane.f32.xlu1 %v1740_v35 }
 0x32e   :  { %v2499_v25 = vpop.eup %2498 }
 0x32f   :  { %v3337_v59 = vpop.eup %2500  ;;  %v1883_v60 = vadd.f32 1.0, %v2499_v25  ;;  %v1886_v2 = vmul.f32 -0.5, %v2499_v25  ;;  %v1889_v48 = vand.u32 2147483647, %v2499_v25 }
 0x330   :  { %1744 = vadd.xlane.f32.xlu1 %v1743_v61  ;;  %v3339_v0 = vpop.eup %2502  ;;  %v1874_v3 = vadd.f32 1.0, %v3337_v59  ;;  %v1877_v29 = vmul.f32 -0.5, %v3337_v59  ;;  %v1880_v12 = vand.u32 2147483647, %v3337_v59 }
 0x331   :  { %v1892_v4 = vadd.f32 1.0, %v3339_v0  ;;  %v1887_v30 = vadd.f32 1.0, %v1886_v2  ;;  %v1895_v26 = vmul.f32 -0.5, %v3339_v0  ;;  %vm3369_vm7 = vcmp.lt.f32.partialorder %v1889_v48, 0.0004427343 }
 0x332   :  { %v1878_v46 = vadd.f32 1.0, %v1877_v29  ;;  %vm3374_vm8 = vcmp.lt.f32.partialorder %v1880_v12, 0.0004427343  ;;  %v1898_v21 = vand.u32 2147483647, %v3339_v0 }
 0x334   :  { %v1879_v2 = vmul.f32 %v3337_v59, %v1878_v46  ;;  %vm3394_vm9 = vcmp.lt.f32.partialorder %v1898_v21, 0.0004427343 }
 0x37c   :  { %v388_v55 = vpop.xlane.xlu0 %387 }
 0x37d   :  { %2504 = vlog2.f32 %v388_v55 }
 0x380   :  { %v391_v57 = vpop.xlane.xlu1 %390 }
 0x381   :  { %v394_v56 = vpop.xlane.xlu0 %393 }
 0x382   :  { %2506 = vlog2.f32 %v394_v56 }
 0x383   :  { %2508 = vlog2.f32 %v1883_v60  ;;  %v1896_v60 = vadd.f32 1.0, %v1895_v26  ;;  %v1796_v26 = vsub.f32 %v1764_v43, %v1780_v19 }
 0x384   :  { %2510 = vlog2.f32 %v1874_v3 }
 0x385   :  { %v981_v14 = vpop.xlane.xlu0 %980  ;;  %v3342_v13 = vpop.xlane.xlu1 %396  ;;  %2512 = vlog2.f32 %v391_v57  ;;  %v1897_v45 = vmul.f32 %v3339_v0, %v1896_v60 }
 0x386   :  { %v3345_v9 = vmul.f32 0.5, %v981_v14  ;;  %2514 = vlog2.f32 %v1892_v4 }
 0x388   :  { %v1085_v53 = vand.u32 2147483647, %v3345_v9 }
 0x389   :  { %v984_v7 = vpop.xlane.xlu0 %983  ;;  %v1709_v10 = vpop.xlane.xlu1 %1708 }
 0x38a   :  { %v2505_v52 = vpop.eup %2504  ;;  %v3348_v20 = vmul.f32 0.5, %v984_v7  ;;  %v3350_v23 = vmul.f32 0.5, %v1709_v10  ;;  %v1101_v63 = vsub.f32 0.0, %v1085_v53 }
 0x38b   :  { %v399_v17 = vmul.f32 0.6931472, %v2505_v52 }
 0x38c   :  { %v1086_v31 = vand.u32 2147483647, %v3348_v20  ;;  %v1813_v34 = vand.u32 2147483647, %v3350_v23  ;;  %v1120_v37 = vmul.f32 1.442695, %v1101_v63 }
 0x38d   :  { %v987_v22 = vpop.xlane.xlu0 %986  ;;  %v1712_v24 = vpop.xlane.xlu1 %1711  ;;  %v406_v41 = vsub.f32 %v3153_v58, %v399_v17  ;;  %v1888_v58 = vmul.f32 %v2499_v25, %v1887_v30 }
 0x38e   :  { %v3360_v35 = vmul.f32 0.5, %v987_v22  ;;  %v3364_v61 = vmul.f32 0.5, %v1712_v24  ;;  %v1102_v49 = vsub.f32 0.0, %v1086_v31  ;;  %v1829_v51 = vsub.f32 0.0, %v1813_v34 }
 0x38f   :  { %v2507_v15 = vpop.eup %2506  ;;  %v414_v55 = vmul.f32 %v410_v40, %v406_v41  ;;  %2516 = vpow2.f32 %v1120_v37 }
 0x390   :  { %v2509_v44 = vpop.eup %2508  ;;  %v1087_v54 = vand.u32 2147483647, %v3360_v35  ;;  %v403_v3 = vmul.f32 0.6931472, %v2507_v15  ;;  %v1814_v25 = vand.u32 2147483647, %v3364_v61 }
 0x391   :  { %v990_v32 = vpop.xlane.xlu0 %989  ;;  %v1715_v33 = vpop.xlane.xlu1 %1714  ;;  %v1885_v4 = vmul.f32 0.6931472, %v2509_v44  ;;  %v418_v10 = vsel %vm361_vm2, %v414_v55, 0.0  ;;  %v1122_v22 = vmul.f32 1.442695, %v1102_v49  ;;  %v411_v44 = vld [vmem:[%s4110_s6 + $0x8] sm:$0xff] }
 0x392   :  { %v2511_v50 = vpop.eup %2510  ;;  %v3381_v14 = vmul.f32 0.5, %v990_v32  ;;  %v3383_v7 = vmul.f32 0.5, %v1715_v33  ;;  %419 = vadd.xlane.f32.xlu0 %v418_v10  ;;  %v1848_v24 = vmul.f32 1.442695, %v1829_v51  ;;  %v1103_v48 = vsub.f32 0.0, %v1087_v54 }
 0x393   :  { %v2513_v56 = vpop.eup %2512  ;;  %v1876_v53 = vmul.f32 0.6931472, %v2511_v50  ;;  %v1830_v63 = vsub.f32 0.0, %v1814_v25  ;;  %v408_v30 = vsub.f32 %v3160_v1, %v403_v3  ;;  %v1891_v29 = vsel %vm3369_vm7, %v1888_v58, %v1885_v4  ;;  %v495_v25 = vld [vmem:[%s4114_s10 + $0x18] sm:$0xff] }
 0x394   :  { %v2515_v52 = vpop.eup %2514  ;;  %v401_v11 = vmul.f32 0.6931472, %v2513_v56  ;;  %v1088_v59 = vand.u32 2147483647, %v3381_v14  ;;  %v1815_v12 = vand.u32 2147483647, %v3383_v7  ;;  %2518 = vpow2.f32 %v1122_v22 }
 0x395   :  { %v993_v57 = vpop.xlane.xlu0 %992  ;;  %v1894_v5 = vmul.f32 0.6931472, %v2515_v52  ;;  %v1882_v31 = vsel %vm3374_vm8, %v1879_v2, %v1876_v53  ;;  %v1718_v34 = vpop.xlane.xlu1 %1717  ;;  %v416_v41 = vmul.f32 %v412_v6, %v408_v30  ;;  %2520 = vpow2.f32 %v1848_v24 }
 0x396   :  { %v3387_v17 = vmul.f32 0.5, %v993_v57  ;;  %v1124_v40 = vmul.f32 1.442695, %v1103_v48  ;;  %v407_v1 = vsub.f32 %v3157_v62, %v401_v11  ;;  %v2019_v15 = vadd.f32 %v1891_v29, %v1795_v27  ;;  %v497_v11 = vld [vmem:[%s4114_s10 + $0x28] sm:$0xff] }
 0x397   :  { %v1850_v18 = vmul.f32 1.442695, %v1830_v63  ;;  %v1104_v37 = vsub.f32 0.0, %v1088_v59  ;;  %v424_v0 = vsel %vm361_vm2, %v416_v41, 0.0  ;;  %v2018_v58 = vadd.f32 %v1882_v31, %v1794_v42  ;;  %v498_v63 = vld [vmem:[%s4114_s10 + $0x30] sm:$0xff] }
 0x398   :  { %v1089_v32 = vand.u32 2147483647, %v3387_v17  ;;  %v1900_v46 = vsel %vm3394_vm9, %v1897_v45, %v1894_v5  ;;  %v1831_v47 = vsub.f32 0.0, %v1815_v12  ;;  %v3414_v49 = vmul.f32 0.5, %v1718_v34  ;;  %425 = vadd.xlane.f32.xlu0 %v424_v0 }
 0x399   :  { %2522 = vlog2.f32 %v3342_v13  ;;  %v415_v27 = vmul.f32 %v411_v44, %v407_v1  ;;  %v2035_v43 = vmul.f32 %v2019_v15, %v3271_v39  ;;  %v2020_v33 = vadd.f32 %v1900_v46, %v1796_v26  ;;  %v996_v13 = vpop.xlane.xlu0 %995  ;;  %v1721_v41 = vpop.xlane.xlu1 %1720 }
 0x39a   :  { %v1105_v62 = vsub.f32 0.0, %v1089_v32  ;;  %2524 = vpow2.f32 %v1124_v40  ;;  %v1126_v50 = vmul.f32 1.442695, %v1104_v37  ;;  %v2034_v21 = vmul.f32 %v2018_v58, %v3280_v36  ;;  %v3473_v37 = vld [vmem:[%s4114_s10 + $0x38] sm:$0xff] }
 0x39b   :  { %2526 = vpow2.f32 %v1850_v18  ;;  %v1852_v42 = vmul.f32 1.442695, %v1831_v47  ;;  %v1816_v51 = vand.u32 2147483647, %v3414_v49  ;;  %v421_v54 = vsel %vm361_vm2, %v415_v27, 0.0 }
 0x39c   :  { %v3421_v55 = vpop.eup %2516  ;;  %v1128_v57 = vmul.f32 1.442695, %v1105_v62  ;;  %422 = vadd.xlane.f32.xlu1 %v421_v54  ;;  %v2051_v56 = vsel %vm442_vm5, %v2035_v43, 0.0  ;;  %v2036_v60 = vmul.f32 %v2020_v33, %v3298_v38  ;;  %2528 = vpow2.f32 %v1126_v50  ;;  %v496_v38 = vld [vmem:[%s4114_s10 + $0x20] sm:$0xff]  ;;  %v413_v33 = vld [vmem:[%s4110_s6 + $0x18] sm:$0xff] }
 0x39d   :  { %v2050_v39 = vsel %vm442_vm5, %v2034_v21, 0.0  ;;  %v1173_v3 = vadd.f32 1.0, %v3421_v55  ;;  %2530 = vpow2.f32 %v1852_v42  ;;  %v1832_v36 = vsub.f32 0.0, %v1816_v51 }
 0x39e   :  { %2532 = vpow2.f32 %v1128_v57  ;;  %v3430_v4 = vmul.f32 0.5, %v996_v13  ;;  %v2052_v53 = vadd.f32 %v2051_v56, %v2050_v39  ;;  %v2053_v2 = vsel %vm442_vm5, %v2036_v60, 0.0 }
 0x39f   :  { %v1037_v22 = vmax.f32 %v3345_v9, 0.0  ;;  %v1053_v19 = vmul.f32 %v3345_v9, %v495_v25  ;;  %2534 = vlog2.f32 %v1173_v3  ;;  %v1854_v24 = vmul.f32 1.442695, %v1832_v36 }
 0x3a0   :  { %v1038_v48 = vmax.f32 %v3348_v20, 0.0  ;;  %v1054_v6 = vmul.f32 %v3348_v20, %v496_v38  ;;  %v1090_v59 = vand.u32 2147483647, %v3430_v4  ;;  %v1765_v9 = vmax.f32 %v3350_v23, 0.0 }
 0x3a1   :  { %v3432_v10 = vpop.eup %2518  ;;  %v1781_v29 = vmul.f32 %v3350_v23, %v495_v25  ;;  %v1039_v45 = vmax.f32 %v3360_v35, 0.0  ;;  %v1055_v20 = vmul.f32 %v3360_v35, %v497_v11  ;;  %v1766_v31 = vmax.f32 %v3364_v61, 0.0 }
 0x3a2   :  { %v3437_v52 = vpop.eup %2520  ;;  %v1182_v28 = vadd.f32 1.0, %v3432_v10  ;;  %v1782_v32 = vmul.f32 %v3364_v61, %v496_v38  ;;  %v1040_v34 = vmax.f32 %v3381_v14, 0.0  ;;  %v1056_v40 = vmul.f32 %v3381_v14, %v498_v63 }
 0x3a3   :  { %v1901_v5 = vadd.f32 1.0, %v3437_v52  ;;  %v1767_v23 = vmax.f32 %v3383_v7, 0.0  ;;  %v1783_v1 = vmul.f32 %v3383_v7, %v497_v11  ;;  %2536 = vpow2.f32 %v1854_v24 }
 0x3a4   :  { %2538 = vlog2.f32 %v1182_v28  ;;  %v1106_v18 = vsub.f32 0.0, %v1090_v59  ;;  %v3467_v35 = vadd.f32 %v2053_v2, %v2052_v53  ;;  %v3475_v0 = vmul.f32 0.5, %v1721_v41  ;;  %v3543_v41 = vld [vmem:[%s4114_s10 + $0x40] sm:$0xff] }
 0x3a5   :  { %2540 = vlog2.f32 %v1901_v5  ;;  %v3477_v14 = vsub.f32 %v1037_v22, %v1053_v19  ;;  %v3479_v44 = vsub.f32 %v1038_v48, %v1054_v6  ;;  %v3481_v7 = vsub.f32 %v1765_v9, %v1781_v29 }
 0x3a6   :  { %v2523_v30 = vpop.eup %2522  ;;  %v3486_v47 = vsub.f32 %v1039_v45, %v1055_v20  ;;  %v3488_v62 = vsub.f32 %v1766_v31, %v1782_v32  ;;  %v3490_v27 = vsub.f32 %v1040_v34, %v1056_v40  ;;  %v3492_v43 = vsub.f32 %v1767_v23, %v1783_v1  ;;  %v999_v1 = vpop.xlane.xlu0 %998 }
 0x3a7   :  { %v3456_v12 = vpop.eup %2524  ;;  %v405_v15 = vmul.f32 0.6931472, %v2523_v30  ;;  %v1041_v21 = vmax.f32 %v3387_v17, 0.0  ;;  %v1057_v42 = vmul.f32 %v3387_v17, %v3473_v37  ;;  %v1130_v51 = vmul.f32 1.442695, %v1106_v18 }
 0x3a8   :  { %v3462_v26 = vpop.eup %2526  ;;  %v1191_v61 = vadd.f32 1.0, %v3456_v12  ;;  %v1176_v13 = vmul.f32 -0.5, %v3421_v55  ;;  %v1768_v56 = vmax.f32 %v3414_v49, 0.0  ;;  %v1817_v60 = vand.u32 2147483647, %v3475_v0 }
 0x3a9   :  { %v1910_v58 = vadd.f32 1.0, %v3462_v26  ;;  %v3484_v46 = vpop.eup %2528  ;;  %v409_v54 = vsub.f32 %v3165_v8, %v405_v15  ;;  %v1185_v39 = vmul.f32 -0.5, %v3432_v10  ;;  %v1179_v17 = vand.u32 2147483647, %v3421_v55 }
 0x3aa   :  { %v3497_v50 = vpop.eup %2530  ;;  %2542 = vlog2.f32 %v1191_v61  ;;  %v1200_v3 = vadd.f32 1.0, %v3484_v46  ;;  %v1188_v25 = vand.u32 2147483647, %v3432_v10  ;;  %v1784_v38 = vmul.f32 %v3414_v49, %v498_v63 }
 0x3ab   :  { %v3503_v57 = vpop.eup %2532  ;;  %2544 = vlog2.f32 %v1910_v58  ;;  %v417_v36 = vmul.f32 %v413_v33, %v409_v54  ;;  %v1919_v8 = vadd.f32 1.0, %v3497_v50  ;;  %v1904_v2 = vmul.f32 -0.5, %v3437_v52 }
 0x3ac   :  { %v2535_v53 = vpop.eup %2534  ;;  %v1907_v22 = vand.u32 2147483647, %v3437_v52  ;;  %v1209_v19 = vadd.f32 1.0, %v3503_v57  ;;  %2546 = vpow2.f32 %v1130_v51  ;;  %v1177_v11 = vadd.f32 1.0, %v1176_v13 }
 0x3ad   :  { %v3517_v24 = vsub.f32 %v1041_v21, %v1057_v42  ;;  %v1833_v48 = vsub.f32 0.0, %v1817_v60  ;;  %v427_v6 = vsel %vm361_vm2, %v417_v36, 0.0  ;;  %v1186_v28 = vadd.f32 1.0, %v1185_v39 }
 0x3ae   :  { %v1194_v59 = vmul.f32 -0.5, %v3456_v12  ;;  %v1913_v30 = vmul.f32 -0.5, %v3462_v26  ;;  %2548 = vlog2.f32 %v1200_v3  ;;  %428 = vadd.xlane.f32.xlu1 %v427_v6  ;;  %v1175_v49 = vmul.f32 0.6931472, %v2535_v53  ;;  %v1002_v6 = vpop.xlane.xlu0 %1001 }
 0x3af   :  { %vm3522_vm10 = vcmp.lt.f32.partialorder %v1179_v17, 0.0004427343  ;;  %2550 = vlog2.f32 %v1919_v8  ;;  %v3526_v9 = vsub.f32 %v1768_v56, %v1784_v38  ;;  %vm3530_vm11 = vcmp.lt.f32.partialorder %v1188_v25, 0.0004427343  ;;  %v1724_v17 = vpop.xlane.xlu1 %1723 }
 0x3b0   :  { %v3528_v29 = vpop.eup %2536  ;;  %v1905_v45 = vadd.f32 1.0, %v1904_v2  ;;  %vm3534_vm12 = vcmp.lt.f32.partialorder %v1907_v22, 0.0004427343  ;;  %2552 = vlog2.f32 %v1209_v19  ;;  %v1178_v32 = vmul.f32 %v3421_v55, %v1177_v11  ;;  %v511_v22 = vld [vmem:[%s4115_s11 + $0x18] sm:$0xff] }
 0x3b1   :  { %v2539_v31 = vpop.eup %2538  ;;  %v1197_v34 = vand.u32 2147483647, %v3456_v12  ;;  %v1042_v40 = vmax.f32 %v3430_v4, 0.0  ;;  %v1856_v23 = vmul.f32 1.442695, %v1833_v48  ;;  %v1187_v18 = vmul.f32 %v3432_v10, %v1186_v28 }
 0x3b2   :  { %v2541_v15 = vpop.eup %2540  ;;  %v1195_v61 = vadd.f32 1.0, %v1194_v59  ;;  %v1914_v58 = vadd.f32 1.0, %v1913_v30  ;;  %v1916_v33 = vand.u32 2147483647, %v3462_v26  ;;  %v1181_v55 = vsel %vm3522_vm10, %v1178_v32, %v1175_v49 }
 0x3b3   :  { %v1203_v21 = vmul.f32 -0.5, %v3484_v46  ;;  %v1922_v42 = vmul.f32 -0.5, %v3497_v50  ;;  %v1928_v51 = vadd.f32 1.0, %v3528_v29  ;;  %v1184_v54 = vmul.f32 0.6931472, %v2539_v31 }
 0x3b4   :  { %v1906_v13 = vmul.f32 %v3437_v52, %v1905_v45  ;;  %v1925_v56 = vand.u32 2147483647, %v3497_v50  ;;  %v3557_v10 = vmul.f32 %v3430_v4, %v3543_v41  ;;  %v1903_v60 = vmul.f32 0.6931472, %v2541_v15 }
 0x3b5   :  { %vm3559_vm13 = vcmp.lt.f32.partialorder %v1197_v34, 0.0004427343  ;;  %v1212_v3 = vmul.f32 -0.5, %v3503_v57  ;;  %2554 = vpow2.f32 %v1856_v23  ;;  %v3564_v36 = vmul.f32 0.5, %v999_v1 }
 0x3b6   :  { %v1293_v52 = vadd.f32 %v1181_v55, %v3477_v14  ;;  %v1196_v8 = vmul.f32 %v3456_v12, %v1195_v61  ;;  %vm3568_vm14 = vcmp.lt.f32.partialorder %v1916_v33, 0.0004427343  ;;  %v1206_v53 = vand.u32 2147483647, %v3484_v46  ;;  %v512_v33 = vld [vmem:[%s4115_s11 + $0x20] sm:$0xff] }
 0x3b7   :  { %v2543_v25 = vpop.eup %2542  ;;  %v1915_v19 = vmul.f32 %v3462_v26, %v1914_v58  ;;  %v1204_v11 = vadd.f32 1.0, %v1203_v21  ;;  %v1923_v48 = vadd.f32 1.0, %v1922_v42  ;;  %2556 = vlog2.f32 %v1928_v51  ;;  %v514_v21 = vld [vmem:[%s4115_s11 + $0x30] sm:$0xff] }
 0x3b8   :  { %v2545_v2 = vpop.eup %2544  ;;  %v1190_v12 = vsel %vm3530_vm11, %v1187_v18, %v1184_v54  ;;  %vm3579_vm15 = vcmp.lt.f32.partialorder %v1925_v56, 0.0004427343  ;;  %v1215_v28 = vand.u32 2147483647, %v3503_v57  ;;  %v3584_v59 = vmul.f32 0.5, %v1724_v17 }
 0x3b9   :  { %v3586_v30 = vpop.eup %2546  ;;  %v1909_v26 = vsel %vm3534_vm12, %v1906_v13, %v1903_v60  ;;  %v1213_v49 = vadd.f32 1.0, %v1212_v3  ;;  %v1931_v63 = vmul.f32 -0.5, %v3528_v29  ;;  %v1091_v45 = vand.u32 2147483647, %v3564_v36 }
 0x3ba   :  { %v1309_v5 = vmul.f32 %v1293_v52, %v511_v22  ;;  %v1193_v31 = vmul.f32 0.6931472, %v2543_v25  ;;  %v1912_v32 = vmul.f32 0.6931472, %v2545_v2  ;;  %vm3592_vm0 = vcmp.lt.f32.partialorder %v1206_v53, 0.0004427343 }
 0x3bb   :  { %v3596_v23 = vmul.f32 0.5, %v1002_v6  ;;  %v2549_v1 = vpop.eup %2548  ;;  %v1294_v15 = vadd.f32 %v1190_v12, %v3479_v44  ;;  %v1205_v20 = vmul.f32 %v3484_v46, %v1204_v11  ;;  %v1924_v18 = vmul.f32 %v3497_v50, %v1923_v48  ;;  %v1727_v46 = vpop.xlane.xlu1 %1726 }
 0x3bc   :  { %v1769_v61 = vmax.f32 %v3475_v0, 0.0  ;;  %v2551_v58 = vpop.eup %2550  ;;  %v2021_v55 = vadd.f32 %v1909_v26, %v3481_v7  ;;  %vm3606_vm1 = vcmp.lt.f32.partialorder %v1215_v28, 0.0004427343  ;;  %v1218_v42 = vadd.f32 1.0, %v3586_v30  ;;  %v513_v26 = vld [vmem:[%s4115_s11 + $0x28] sm:$0xff] }
 0x3bd   :  { %v1818_v44 = vand.u32 2147483647, %v3584_v59  ;;  %v2553_v51 = vpop.eup %2552  ;;  %v1214_v50 = vmul.f32 %v3503_v57, %v1213_v49  ;;  %v1932_v54 = vadd.f32 1.0, %v1931_v63  ;;  %v1934_v13 = vand.u32 2147483647, %v3528_v29  ;;  %v1005_v57 = vpop.xlane.xlu0 %1004 }
 0x3be   :  { %v1107_v56 = vsub.f32 0.0, %v1091_v45  ;;  %v1327_v60 = vsel %vm442_vm5, %v1309_v5, 0.0  ;;  %v1199_v7 = vsel %vm3559_vm13, %v1196_v8, %v1193_v31  ;;  %v1918_v3 = vsel %vm3568_vm14, %v1915_v19, %v1912_v32 }
 0x3bf   :  { %v1092_v17 = vand.u32 2147483647, %v3596_v23  ;;  %v1310_v25 = vmul.f32 %v1294_v15, %v512_v33  ;;  %v1202_v52 = vmul.f32 0.6931472, %v2549_v1  ;;  %v1921_v53 = vmul.f32 0.6931472, %v2551_v58 }
 0x3c0   :  { %v3620_v2 = vmul.f32 0.5, %v1727_v46  ;;  %v2037_v11 = vmul.f32 %v2021_v55, %v511_v22  ;;  %v1211_v48 = vmul.f32 0.6931472, %v2553_v51  ;;  %2558 = vlog2.f32 %v1218_v42  ;;  %v1730_v42 = vpop.xlane.xlu1 %1729 }
 0x3c1   :  { %v1834_v6 = vsub.f32 0.0, %v1818_v44  ;;  %v1295_v12 = vadd.f32 %v1199_v7, %v3486_v47  ;;  %v2022_v39 = vadd.f32 %v1918_v3, %v3488_v62  ;;  %v1785_v8 = vmul.f32 %v3475_v0, %v3473_v37  ;;  %v1008_v34 = vpop.xlane.xlu0 %1007 }
 0x3c2   :  { %v1132_v38 = vmul.f32 1.442695, %v1107_v56  ;;  %v3626_v19 = vpop.eup %2554  ;;  %v1328_v28 = vadd.f32 %v1327_v60, %v3316_v16  ;;  %v1933_v22 = vmul.f32 %v3528_v29, %v1932_v54  ;;  %vm3633_vm2 = vcmp.lt.f32.partialorder %v1934_v13, 0.0004427343 }
 0x3c3   :  { %v1108_v47 = vsub.f32 0.0, %v1092_v17  ;;  %v1329_v62 = vsel %vm442_vm5, %v1310_v25, 0.0  ;;  %v1208_v37 = vsel %vm3592_vm0, %v1205_v20, %v1202_v52  ;;  %v1927_v63 = vsel %vm3579_vm15, %v1924_v18, %v1921_v53 }
 0x3c4   :  { %v1819_v16 = vand.u32 2147483647, %v3620_v2  ;;  %v2557_v45 = vpop.eup %2556  ;;  %v2055_v5 = vsel %vm442_vm5, %v2037_v11, 0.0  ;;  %v1217_v29 = vsel %vm3606_vm1, %v1214_v50, %v1211_v48  ;;  %v1858_v31 = vmul.f32 1.442695, %v1834_v6 }
 0x3c5   :  { %v3646_v32 = vmul.f32 0.5, %v1005_v57  ;;  %v1311_v1 = vmul.f32 %v1295_v12, %v513_v26  ;;  %v2038_v15 = vmul.f32 %v2022_v39, %v512_v33  ;;  %v1937_v58 = vadd.f32 1.0, %v3626_v19  ;;  %v1733_v12 = vpop.xlane.xlu1 %1732  ;;  %v1011_v39 = vpop.xlane.xlu0 %1010 }
 0x3c6   :  { %2560 = vpow2.f32 %v1132_v38  ;;  %v1296_v14 = vadd.f32 %v1208_v37, %v3490_v27  ;;  %v2023_v20 = vadd.f32 %v1927_v63, %v3492_v43  ;;  %v1043_v18 = vmax.f32 %v3564_v36, 0.0  ;;  %v3660_v27 = vld [vmem:[%s4115_s11 + $0x38] sm:$0xff]  ;;  %v3665_v43 = vld [vmem:[%s4114_s10 + $0x48] sm:$0xff] }
 0x3c7   :  { %v1134_v55 = vmul.f32 1.442695, %v1108_v47  ;;  %v1330_v44 = vadd.f32 %v1329_v62, %v1328_v28  ;;  %v1297_v46 = vadd.f32 %v1217_v29, %v3517_v24  ;;  %v1930_v33 = vmul.f32 0.6931472, %v2557_v45 }
 0x3c8   :  { %v1835_v51 = vsub.f32 0.0, %v1819_v16  ;;  %v2056_v50 = vadd.f32 %v2055_v5, %v3467_v35  ;;  %2562 = vpow2.f32 %v1858_v31  ;;  %v1093_v54 = vand.u32 2147483647, %v3646_v32 }
 0x3c9   :  { %v3668_v13 = vmul.f32 0.5, %v1008_v34  ;;  %v1331_v24 = vsel %vm442_vm5, %v1311_v1, 0.0  ;;  %v2057_v56 = vsel %vm442_vm5, %v2038_v15, 0.0  ;;  %v1221_v35 = vmul.f32 -0.5, %v3586_v30  ;;  %v502_v15 = vld [vmem:[%s4114_s10 + $0x50] sm:$0xff] }
 0x3ca   :  { %2564 = vlog2.f32 %v1937_v58  ;;  %v1312_v60 = vmul.f32 %v1296_v14, %v514_v21  ;;  %v2039_v7 = vmul.f32 %v2023_v20, %v513_v26  ;;  %v3673_v3 = vmul.f32 0.5, %v1730_v42  ;;  %v1736_v14 = vpop.xlane.xlu1 %1735 }
 0x3cb   :  { %2566 = vpow2.f32 %v1134_v55  ;;  %v1313_v17 = vmul.f32 %v1297_v46, %v3660_v27  ;;  %v1936_v25 = vsel %vm3633_vm2, %v1933_v22, %v1930_v33  ;;  %v1059_v52 = vmul.f32 %v3564_v36, %v3665_v43 }
 0x3cc   :  { %v1860_v53 = vmul.f32 1.442695, %v1835_v51  ;;  %v1074_v57 = vsub.f32 %v1042_v40, %v3557_v10  ;;  %v3685_v11 = vsub.f32 %v1769_v61, %v1785_v8  ;;  %v1109_v48 = vsub.f32 0.0, %v1093_v54 }
 0x3cd   :  { %v1094_v6 = vand.u32 2147483647, %v3668_v13  ;;  %v2559_v38 = vpop.eup %2558  ;;  %v1332_v28 = vadd.f32 %v1331_v24, %v1330_v44  ;;  %v2058_v26 = vadd.f32 %v2057_v56, %v2056_v50  ;;  %v1222_v22 = vadd.f32 1.0, %v1221_v35 }
 0x3ce   :  { %v1224_v36 = vand.u32 2147483647, %v3586_v30  ;;  %v1333_v49 = vsel %vm442_vm5, %v1312_v60, 0.0  ;;  %v2059_v4 = vsel %vm442_vm5, %v2039_v7, 0.0  ;;  %v2024_v40 = vadd.f32 %v1936_v25, %v3526_v9  ;;  %v1014_v7 = vpop.xlane.xlu0 %1013 }
 0x3cf   :  { %v1820_v0 = vand.u32 2147483647, %v3673_v3  ;;  %v1335_v10 = vsel %vm442_vm5, %v1313_v17, 0.0  ;;  %v3694_v61 = vsub.f32 %v1043_v18, %v1059_v52  ;;  %2568 = vpow2.f32 %v1860_v53 }
 0x3d0   :  { %v3696_v8 = vmul.f32 0.5, %v1011_v39  ;;  %v1220_v47 = vmul.f32 0.6931472, %v2559_v38  ;;  %v1940_v62 = vmul.f32 -0.5, %v3626_v19  ;;  %v1136_v37 = vmul.f32 1.442695, %v1109_v48 }
 0x3d1   :  { %v1110_v63 = vsub.f32 0.0, %v1094_v6  ;;  %v1334_v16 = vadd.f32 %v1333_v49, %v1332_v28  ;;  %v2060_v45 = vadd.f32 %v2059_v4, %v2058_v26  ;;  %v1223_v5 = vmul.f32 %v3586_v30, %v1222_v22  ;;  %v3744_v48 = vld [vmem:[%s4115_s11 + $0x40] sm:$0xff] }
 0x3d2   :  { %vm3700_vm3 = vcmp.lt.f32.partialorder %v1224_v36, 0.0004427343  ;;  %v2040_v31 = vmul.f32 %v2024_v40, %v514_v21  ;;  %v1770_v1 = vmax.f32 %v3584_v59, 0.0  ;;  %v1836_v58 = vsub.f32 0.0, %v1820_v0 }
 0x3d3   :  { %v3704_v29 = vpop.eup %2560  ;;  %v3710_v34 = vmul.f32 0.5, %v1733_v12  ;;  %v3712_v20 = vadd.f32 %v1335_v10, %v1334_v16  ;;  %v1943_v30 = vand.u32 2147483647, %v3626_v19  ;;  %v1786_v18 = vmul.f32 %v3584_v59, %v3543_v41  ;;  %v503_v41 = vld [vmem:[%s4114_s10 + $0x58] sm:$0xff] }
 0x3d4   :  { %v1095_v55 = vand.u32 2147483647, %v3696_v8  ;;  %v1226_v42 = vsel %vm3700_vm3, %v1223_v5, %v1220_v47  ;;  %v1941_v44 = vadd.f32 1.0, %v1940_v62  ;;  %2570 = vpow2.f32 %v1136_v37  ;;  %v3772_v62 = vld [vmem:[%s4114_s10 + $0x60] sm:$0xff] }
 0x3d5   :  { %v1138_v21 = vmul.f32 1.442695, %v1110_v63  ;;  %v3720_v46 = vpop.eup %2562  ;;  %v1227_v33 = vadd.f32 1.0, %v3704_v29  ;;  %v1044_v51 = vmax.f32 %v3596_v23, 0.0  ;;  %v1060_v50 = vmul.f32 %v3596_v23, %v502_v15 }
 0x3d6   :  { %v3728_v59 = vmul.f32 0.5, %v1736_v14  ;;  %v2061_v24 = vsel %vm442_vm5, %v2040_v31, 0.0  ;;  %v1771_v56 = vmax.f32 %v3620_v2, 0.0  ;;  %v1862_v35 = vmul.f32 1.442695, %v1836_v58 }
 0x3d7   :  { %v2565_v54 = vpop.eup %2564  ;;  %v1821_v60 = vand.u32 2147483647, %v3710_v34  ;;  %v1298_v25 = vadd.f32 %v1226_v42, %v1074_v57  ;;  %vm3735_vm4 = vcmp.lt.f32.partialorder %v1943_v30, 0.0004427343  ;;  %v1787_v52 = vmul.f32 %v3620_v2, %v3665_v43  ;;  %v3790_v30 = vld [vmem:[%s4114_s10 + $0x68] sm:$0xff] }
 0x3d8   :  { %v3733_v17 = vpop.eup %2566  ;;  %v1111_v53 = vsub.f32 0.0, %v1095_v55  ;;  %v1942_v6 = vmul.f32 %v3626_v19, %v1941_v44  ;;  %v1045_v12 = vmax.f32 %v3646_v32, 0.0  ;;  %v1061_v39 = vmul.f32 %v3646_v32, %v503_v41 }
 0x3d9   :  { %2572 = vpow2.f32 %v1138_v21  ;;  %v1946_v57 = vadd.f32 1.0, %v3720_v46  ;;  %v1822_v38 = vand.u32 2147483647, %v3728_v59  ;;  %v3751_v28 = vmul.f32 0.5, %v1014_v7 }
 0x3da   :  { %2574 = vlog2.f32 %v1227_v33  ;;  %v1939_v2 = vmul.f32 0.6931472, %v2565_v54  ;;  %v1236_v43 = vadd.f32 1.0, %v3733_v17  ;;  %v1837_v26 = vsub.f32 0.0, %v1821_v60  ;;  %v1739_v33 = vpop.xlane.xlu1 %1738 }
 0x3db   :  { %2576 = vpow2.f32 %v1862_v35  ;;  %v1314_v22 = vmul.f32 %v1298_v25, %v3744_v48  ;;  %v1772_v19 = vmax.f32 %v3673_v3, 0.0  ;;  %v1788_v36 = vmul.f32 %v3673_v3, %v502_v15 }
 0x3dc   :  { %v1140_v32 = vmul.f32 1.442695, %v1111_v53  ;;  %v3757_v49 = vpop.eup %2568  ;;  %v3759_v4 = vadd.f32 %v2061_v24, %v2060_v45  ;;  %v3761_v40 = vsub.f32 %v1770_v1, %v1786_v18  ;;  %v3763_v0 = vsub.f32 %v1044_v51, %v1060_v50 }
 0x3dd   :  { %v3765_v10 = vsub.f32 %v1771_v56, %v1787_v52  ;;  %2578 = vlog2.f32 %v1946_v57  ;;  %v3767_v47 = vsub.f32 %v1045_v12, %v1061_v39  ;;  %v1838_v3 = vsub.f32 0.0, %v1822_v38  ;;  %v1017_v38 = vpop.xlane.xlu0 %1016 }
 0x3de   :  { %v1096_v37 = vand.u32 2147483647, %v3751_v28  ;;  %v1945_v63 = vsel %vm3735_vm4, %v1942_v6, %v1939_v2  ;;  %v1230_v16 = vmul.f32 -0.5, %v3704_v29  ;;  %2580 = vlog2.f32 %v1236_v43  ;;  %v1742_v2 = vpop.xlane.xlu1 %1741 }
 0x3df   :  { %v1864_v45 = vmul.f32 1.442695, %v1837_v26  ;;  %v1337_v5 = vsel %vm442_vm5, %v1314_v22, 0.0  ;;  %v1955_v9 = vadd.f32 1.0, %v3757_v49  ;;  %v3780_v31 = vsub.f32 %v1772_v19, %v1788_v36 }
 0x3e0   :  { %2582 = vpow2.f32 %v1140_v32  ;;  %v1949_v1 = vmul.f32 -0.5, %v3720_v46  ;;  %v1046_v15 = vmax.f32 %v3668_v13, 0.0  ;;  %v1062_v58 = vmul.f32 %v3668_v13, %v3772_v62 }
 0x3e1   :  { %v1773_v14 = vmax.f32 %v3710_v34, 0.0  ;;  %v3792_v18 = vpop.eup %2570  ;;  %v2025_v55 = vadd.f32 %v1945_v63, %v3685_v11  ;;  %v1789_v42 = vmul.f32 %v3710_v34, %v503_v41  ;;  %v1866_v44 = vmul.f32 1.442695, %v1838_v3 }
 0x3e2   :  { %v1112_v21 = vsub.f32 0.0, %v1096_v37  ;;  %v3797_v51 = vadd.f32 %v1337_v5, %v3712_v20  ;;  %v1231_v13 = vadd.f32 1.0, %v1230_v16  ;;  %v1233_v50 = vand.u32 2147483647, %v3704_v29 }
 0x3e3   :  { %2584 = vpow2.f32 %v1864_v45  ;;  %v1239_v54 = vmul.f32 -0.5, %v3733_v17  ;;  %v1047_v24 = vmax.f32 %v3696_v8, 0.0  ;;  %v1063_v11 = vmul.f32 %v3696_v8, %v3790_v30 }
 0x3e4   :  { %2586 = vlog2.f32 %v1955_v9  ;;  %v1950_v56 = vadd.f32 1.0, %v1949_v1  ;;  %v1952_v34 = vand.u32 2147483647, %v3720_v46  ;;  %v1245_v41 = vadd.f32 1.0, %v3792_v18 }
 0x3e5   :  { %v3806_v35 = vmul.f32 0.5, %v1739_v33  ;;  %v2041_v60 = vmul.f32 %v2025_v55, %v3660_v27  ;;  %v1958_v7 = vmul.f32 -0.5, %v3757_v49  ;;  %2588 = vpow2.f32 %v1866_v44 }
 0x3e6   :  { %v3808_v20 = vpop.eup %2572  ;;  %v1142_v25 = vmul.f32 1.442695, %v1112_v21  ;;  %vm3812_vm6 = vcmp.lt.f32.partialorder %v1233_v50, 0.0004427343  ;;  %v1242_v8 = vand.u32 2147483647, %v3733_v17  ;;  %v3817_v53 = vsub.f32 %v1046_v15, %v1062_v58 }
 0x3e7   :  { %v2575_v23 = vpop.eup %2574  ;;  %v3819_v6 = vsub.f32 %v1773_v14, %v1789_v42  ;;  %v1232_v39 = vmul.f32 %v3704_v29, %v1231_v13  ;;  %v1240_v27 = vadd.f32 1.0, %v1239_v54  ;;  %v3824_v57 = vsub.f32 %v1047_v24, %v1063_v11  ;;  %v3867_v13 = vld [vmem:[%s4114_s10 + $0x70] sm:$0xff] }
 0x3e8   :  { %v3821_v12 = vpop.eup %2576  ;;  %2590 = vpow2.f32 %v1142_v25  ;;  %v1961_v43 = vand.u32 2147483647, %v3757_v49  ;;  %v1254_v26 = vadd.f32 1.0, %v3808_v20  ;;  %v1823_v22 = vand.u32 2147483647, %v3806_v35 }
 0x3e9   :  { %2592 = vlog2.f32 %v1245_v41  ;;  %v2063_v19 = vsel %vm442_vm5, %v2041_v60, 0.0  ;;  %v1951_v36 = vmul.f32 %v3720_v46, %v1950_v56  ;;  %vm3831_vm7 = vcmp.lt.f32.partialorder %v1952_v34, 0.0004427343 }
 0x3ea   :  { %v1959_v29 = vadd.f32 1.0, %v1958_v7  ;;  %v2579_v3 = vpop.eup %2578  ;;  %v1229_v37 = vmul.f32 0.6931472, %v2575_v23  ;;  %vm3835_vm8 = vcmp.lt.f32.partialorder %v1242_v8, 0.0004427343  ;;  %v1964_v16 = vadd.f32 1.0, %v3821_v12 }
 0x3eb   :  { %v3840_v45 = vmul.f32 0.5, %v1017_v38  ;;  %v2581_v5 = vpop.eup %2580  ;;  %v1241_v9 = vmul.f32 %v3733_v17, %v1240_v27  ;;  %v1774_v46 = vmax.f32 %v3728_v59, 0.0  ;;  %v1790_v1 = vmul.f32 %v3728_v59, %v3772_v62  ;;  %v1745_v62 = vpop.xlane.xlu1 %1744  ;;  %v517_v27 = vld [vmem:[%s4115_s11 + $0x48] sm:$0xff] }
 0x3ec   :  { %v1839_v15 = vsub.f32 0.0, %v1823_v22  ;;  %v3849_v14 = vadd.f32 %v2063_v19, %v3759_v4  ;;  %vm3851_vm9 = vcmp.lt.f32.partialorder %v1961_v43, 0.0004427343  ;;  %v1248_v42 = vmul.f32 -0.5, %v3792_v18 }
 0x3ed   :  { %v3846_v58 = vpop.eup %2582  ;;  %2594 = vlog2.f32 %v1254_v26  ;;  %v3857_v17 = vmul.f32 %v3757_v49, %v1959_v29  ;;  %v1251_v44 = vand.u32 2147483647, %v3792_v18  ;;  %v3860_v59 = vmul.f32 0.5, %v1742_v2 }
 0x3ee   :  { %v1868_v21 = vmul.f32 1.442695, %v1839_v15  ;;  %v1235_v4 = vsel %vm3812_vm6, %v1232_v39, %v1229_v37  ;;  %v1948_v33 = vmul.f32 0.6931472, %v2579_v3  ;;  %2596 = vlog2.f32 %v1964_v16 }
 0x3ef   :  { %v1097_v50 = vand.u32 2147483647, %v3840_v45  ;;  %v1238_v54 = vmul.f32 0.6931472, %v2581_v5  ;;  %v1263_v24 = vadd.f32 1.0, %v3846_v58  ;;  %v3873_v11 = vsub.f32 %v1774_v46, %v1790_v1 }
 0x3f0   :  { %v3870_v49 = vpop.eup %2584  ;;  %2598 = vpow2.f32 %v1868_v21  ;;  %v1249_v34 = vadd.f32 1.0, %v1248_v42  ;;  %v1048_v41 = vmax.f32 %v3751_v28, 0.0  ;;  %v3876_v7 = vmul.f32 0.5, %v1745_v62 }
 0x3f1   :  { %v2587_v56 = vpop.eup %2586  ;;  %v1113_v60 = vsub.f32 0.0, %v1097_v50  ;;  %v1299_v25 = vadd.f32 %v1235_v4, %v3694_v61  ;;  %v1967_v23 = vmul.f32 -0.5, %v3821_v12  ;;  %v1064_v52 = vmul.f32 %v3751_v28, %v3867_v13 }
 0x3f2   :  { %v1824_v8 = vand.u32 2147483647, %v3860_v59  ;;  %v3883_v39 = vpop.eup %2588  ;;  %v1954_v38 = vsel %vm3831_vm7, %v1951_v36, %v1948_v33  ;;  %v1970_v2 = vand.u32 2147483647, %v3821_v12  ;;  %v1973_v61 = vadd.f32 1.0, %v3870_v49 }
 0x3f3   :  { %v1144_v43 = vmul.f32 1.442695, %v1113_v60  ;;  %v1244_v26 = vsel %vm3835_vm8, %v1241_v9, %v1238_v54  ;;  %v1957_v28 = vmul.f32 0.6931472, %v2587_v56  ;;  %vm3894_vm10 = vcmp.lt.f32.partialorder %v1251_v44, 0.0004427343 }
 0x3f4   :  { %2600 = vlog2.f32 %v1263_v24  ;;  %v1840_v19 = vsub.f32 0.0, %v1824_v8  ;;  %v1250_v32 = vmul.f32 %v3792_v18, %v1249_v34  ;;  %v1257_v36 = vmul.f32 -0.5, %v3808_v20  ;;  %v3910_v18 = vld [vmem:[%s4115_s11 + $0x50] sm:$0xff] }
 0x3f5   :  { %v3898_v29 = vpop.eup %2590  ;;  %2602 = vpow2.f32 %v1144_v43  ;;  %v1825_v3 = vand.u32 2147483647, %v3876_v7  ;;  %v1315_v16 = vmul.f32 %v1299_v25, %v517_v27  ;;  %v2026_v63 = vadd.f32 %v1954_v38, %v3761_v40 }
 0x3f6   :  { %v2593_v37 = vpop.eup %2592  ;;  %v1982_v5 = vadd.f32 1.0, %v3883_v39  ;;  %v1272_v9 = vadd.f32 1.0, %v3898_v29  ;;  %v1300_v46 = vadd.f32 %v1244_v26, %v3763_v0  ;;  %2604 = vlog2.f32 %v1973_v61 }
 0x3f7   :  { %v1870_v1 = vmul.f32 1.442695, %v1840_v19  ;;  %v1841_v15 = vsub.f32 0.0, %v1825_v3  ;;  %v1963_v42 = vsel %vm3851_vm9, %v3857_v17, %v1957_v28  ;;  %v1968_v44 = vadd.f32 1.0, %v1967_v23  ;;  %v3950_v3 = vld [vmem:[%s4115_s11 + $0x58] sm:$0xff] }
 0x3f8   :  { %v1260_v40 = vand.u32 2147483647, %v3808_v20  ;;  %2606 = vlog2.f32 %v1272_v9  ;;  %v1247_v21 = vmul.f32 0.6931472, %v2593_v37  ;;  %v1258_v62 = vadd.f32 1.0, %v1257_v36 }
 0x3f9   :  { %2608 = vpow2.f32 %v1870_v1  ;;  %v1872_v0 = vmul.f32 1.442695, %v1841_v15  ;;  %v1339_v33 = vsel %vm442_vm5, %v1315_v16, 0.0  ;;  %v2042_v50 = vmul.f32 %v2026_v63, %v3744_v48 }
 0x3fa   :  { %v2595_v4 = vpop.eup %2594  ;;  %v1976_v54 = vmul.f32 -0.5, %v3870_v49  ;;  %2610 = vlog2.f32 %v1982_v5  ;;  %v1316_v24 = vmul.f32 %v1300_v46, %v3910_v18  ;;  %v2027_v55 = vadd.f32 %v1963_v42, %v3765_v10 }
 0x3fb   :  { %v1266_v17 = vmul.f32 -0.5, %v3846_v58  ;;  %2612 = vpow2.f32 %v1872_v0  ;;  %v2597_v56 = vpop.eup %2596  ;;  %v1969_v34 = vmul.f32 %v3821_v12, %v1968_v44  ;;  %vm3923_vm11 = vcmp.lt.f32.partialorder %v1970_v2, 0.0004427343 }
 0x3fc   :  { %vm3927_vm12 = vcmp.lt.f32.partialorder %v1260_v40, 0.0004427343  ;;  %v3931_v48 = vsub.f32 %v1048_v41, %v1064_v52  ;;  %v1340_v10 = vadd.f32 %v1339_v33, %v3797_v51  ;;  %v1253_v8 = vsel %vm3894_vm10, %v1250_v32, %v1247_v21 }
 0x3fd   :  { %v3933_v23 = vpop.eup %2598  ;;  %v1256_v38 = vmul.f32 0.6931472, %v2595_v4  ;;  %v1259_v12 = vmul.f32 %v3808_v20, %v1258_v62  ;;  %v2065_v2 = vsel %vm442_vm5, %v2042_v50, 0.0  ;;  %v1977_v61 = vadd.f32 1.0, %v1976_v54  ;;  %v3980_v62 = vld [vmem:[%s4115_s11 + $0x60] sm:$0xff] }
 0x3fe   :  { %v1979_v43 = vand.u32 2147483647, %v3870_v49  ;;  %v1991_v26 = vadd.f32 1.0, %v3933_v23  ;;  %v1341_v41 = vsel %vm442_vm5, %v1316_v24, 0.0  ;;  %v2043_v52 = vmul.f32 %v2027_v55, %v517_v27 }
 0x3ff   :  { %v1966_v28 = vmul.f32 0.6931472, %v2597_v56  ;;  %v1267_v19 = vadd.f32 1.0, %v1266_v17  ;;  %v1301_v51 = vadd.f32 %v1253_v8, %v3767_v47  ;;  %v1269_v22 = vand.u32 2147483647, %v3846_v58 }
 0x400   :  { %v1775_v32 = vmax.f32 %v3806_v35, 0.0  ;;  %2614 = vlog2.f32 %v1991_v26  ;;  %v2066_v36 = vadd.f32 %v2065_v2, %v3849_v14  ;;  %v1262_v27 = vsel %vm3927_vm12, %v1259_v12, %v1256_v38 }
 0x401   :  { %v2601_v20 = vpop.eup %2600  ;;  %v1275_v37 = vmul.f32 -0.5, %v3898_v29  ;;  %v1791_v47 = vmul.f32 %v3806_v35, %v3790_v30  ;;  %v1342_v63 = vadd.f32 %v1341_v41, %v1340_v10  ;;  %v1978_v5 = vmul.f32 %v3870_v49, %v1977_v61 }
 0x402   :  { %v3957_v16 = vpop.eup %2602  ;;  %vm3960_vm13 = vcmp.lt.f32.partialorder %v1979_v43, 0.0004427343  ;;  %v1985_v9 = vmul.f32 -0.5, %v3883_v39  ;;  %v2067_v46 = vsel %vm442_vm5, %v2043_v52, 0.0  ;;  %v1972_v1 = vsel %vm3923_vm11, %v1969_v34, %v1966_v28  ;;  %v507_v52 = vld [vmem:[%s4114_s10 + $0x78] sm:$0xff] }
 0x403   :  { %v1268_v15 = vmul.f32 %v3846_v58, %v1267_v19  ;;  %v1281_v30 = vadd.f32 1.0, %v3957_v16  ;;  %v2605_v35 = vpop.eup %2604  ;;  %v1317_v42 = vmul.f32 %v1301_v51, %v3950_v3  ;;  %v1302_v49 = vadd.f32 %v1262_v27, %v3817_v53 }
 0x404   :  { %vm3972_vm14 = vcmp.lt.f32.partialorder %v1269_v22, 0.0004427343  ;;  %v1994_v40 = vmul.f32 -0.5, %v3933_v23  ;;  %v1265_v58 = vmul.f32 0.6931472, %v2601_v20  ;;  %v1276_v0 = vadd.f32 1.0, %v1275_v37 }
 0x405   :  { %v2607_v21 = vpop.eup %2606  ;;  %v3982_v4 = vsub.f32 %v1775_v32, %v1791_v47  ;;  %2616 = vlog2.f32 %v1281_v30  ;;  %v3986_v53 = vadd.f32 %v2067_v46, %v2066_v36  ;;  %v2028_v50 = vadd.f32 %v1972_v1, %v3780_v31  ;;  %v522_v1 = vld [vmem:[%s4115_s11 + $0x70] sm:$0xff] }
 0x406   :  { %v3984_v33 = vpop.eup %2608  ;;  %v1986_v54 = vadd.f32 1.0, %v1985_v9  ;;  %v1278_v24 = vand.u32 2147483647, %v3898_v29  ;;  %v1988_v17 = vand.u32 2147483647, %v3883_v39  ;;  %v1049_v34 = vmax.f32 %v3840_v45, 0.0 }
 0x407   :  { %v2611_v55 = vpop.eup %2610  ;;  %v1274_v56 = vmul.f32 0.6931472, %v2607_v21  ;;  %v2000_v60 = vadd.f32 1.0, %v3984_v33  ;;  %v1343_v10 = vsel %vm442_vm5, %v1317_v42, 0.0  ;;  %v1318_v8 = vmul.f32 %v1302_v49, %v3980_v62 }
 0x408   :  { %v3993_v25 = vpop.eup %2612  ;;  %v1975_v38 = vmul.f32 0.6931472, %v2605_v35  ;;  %v1995_v12 = vadd.f32 1.0, %v1994_v40  ;;  %v1271_v31 = vsel %vm3972_vm14, %v1268_v15, %v1265_v58  ;;  %v1277_v2 = vmul.f32 %v3898_v29, %v1276_v0 }
 0x409   :  { %v1997_v61 = vand.u32 2147483647, %v3933_v23  ;;  %2618 = vlog2.f32 %v2000_v60  ;;  %v1984_v43 = vmul.f32 0.6931472, %v2611_v55  ;;  %v1987_v26 = vmul.f32 %v3883_v39, %v1986_v54 }
 0x40a   :  { %vm4002_vm15 = vcmp.lt.f32.partialorder %v1278_v24, 0.0004427343  ;;  %v2009_v28 = vadd.f32 1.0, %v3993_v25  ;;  %v2044_v19 = vmul.f32 %v2028_v50, %v3910_v18  ;;  %vm4011_vm0 = vcmp.lt.f32.partialorder %v1988_v17, 0.0004427343  ;;  %v521_v18 = vld [vmem:[%s4115_s11 + $0x68] sm:$0xff] }
 0x40b   :  { %v1280_v51 = vsel %vm4002_vm15, %v1277_v2, %v1274_v56  ;;  %v1284_v39 = vmul.f32 -0.5, %v3957_v16  ;;  %v1981_v22 = vsel %vm3960_vm13, %v1978_v5, %v1975_v38  ;;  %v1303_v32 = vadd.f32 %v1271_v31, %v3824_v57 }
 0x40c   :  { %v1996_v20 = vmul.f32 %v3933_v23, %v1995_v12  ;;  %2620 = vlog2.f32 %v2009_v28  ;;  %v1344_v27 = vadd.f32 %v1343_v10, %v1342_v63  ;;  %vm4025_vm1 = vcmp.lt.f32.partialorder %v1997_v61, 0.0004427343 }
 0x40d   :  { %v2615_v36 = vpop.eup %2614  ;;  %v1065_v47 = vmul.f32 %v3840_v45, %v507_v52  ;;  %v2003_v14 = vmul.f32 -0.5, %v3984_v33  ;;  %v1345_v5 = vsel %vm442_vm5, %v1318_v8, 0.0  ;;  %v1990_v57 = vsel %vm4011_vm0, %v1987_v26, %v1984_v43 }
 0x40e   :  { %v1304_v23 = vadd.f32 %v1280_v51, %v3931_v48  ;;  %v1993_v63 = vmul.f32 0.6931472, %v2615_v36  ;;  %v2069_v9 = vsel %vm442_vm5, %v2044_v19, 0.0  ;;  %v2029_v46 = vadd.f32 %v1981_v22, %v3819_v6 }
 0x40f   :  { %v1285_v15 = vadd.f32 1.0, %v1284_v39  ;;  %v1776_v45 = vmax.f32 %v3860_v59, 0.0  ;;  %v1319_v30 = vmul.f32 %v1303_v32, %v521_v18  ;;  %v1287_v42 = vand.u32 2147483647, %v3957_v16 }
 0x410   :  { %v1999_v35 = vsel %vm4025_vm1, %v1996_v20, %v1993_v63  ;;  %v2012_v48 = vmul.f32 -0.5, %v3993_v25  ;;  %v1346_v49 = vadd.f32 %v1345_v5, %v1344_v27  ;;  %v2030_v44 = vadd.f32 %v1990_v57, %v3873_v11 }
 0x411   :  { %v1081_v40 = vsub.f32 %v1049_v34, %v1065_v47  ;;  %v2004_v6 = vadd.f32 1.0, %v2003_v14  ;;  %v1320_v58 = vmul.f32 %v1304_v23, %v522_v1  ;;  %v1792_v0 = vmul.f32 %v3860_v59, %v3867_v13  ;;  %v523_v59 = vld [vmem:[%s4115_s11 + $0x78] sm:$0xff]  ;;  %s2686_s11 = smov [#allocation4]  }
 0x412   :  { %v2617_v21 = vpop.eup %2616  ;;  %v2006_v50 = vand.u32 2147483647, %v3984_v33  ;;  %v1777_v54 = vmax.f32 %v3876_v7, 0.0  ;;  %v2045_v24 = vmul.f32 %v2029_v46, %v3950_v3  ;;  %v2031_v55 = vadd.f32 %v1999_v35, %v3982_v4  ;;  %s2104_s23 = sshll.u32 %s2686_s11, 4  ;;  %s2105_s23 = int_to_ptr.vmem [resolvable:$true] %s2104_s23 }
 0x413   :  { %v1283_v17 = vmul.f32 0.6931472, %v2617_v21  ;;  %v1286_v56 = vmul.f32 %v3957_v16, %v1285_v15  ;;  %v1347_v11 = vsel %vm442_vm5, %v1319_v30, 0.0  ;;  %vm1288_vm2 = vcmp.lt.f32.partialorder %v1287_v42, 0.0004427343  ;;  %s2622_s24 = scalar_lea.vmem %s2105_s23, 16  ;;  %p2627_p1 = scmp.lt.s32.totalorder %s2105_s23, %s2105_s23 }
 0x414   :  { %v1793_v34 = vmul.f32 %v3876_v7, %v507_v52  ;;  %v2013_v60 = vadd.f32 1.0, %v2012_v48  ;;  %v2046_v10 = vmul.f32 %v2030_v44, %v3980_v62  ;;  %v2005_v3 = vmul.f32 %v3984_v33, %v2004_v6  ;;  %p2623_p0 = scmp.ne.s32.totalorder %s2105_s23, %s2622_s24  ;;  %s2626_s1 = scalar_lea.vmem %s2105_s23, 32 }
 0x415   :  { %v1289_v13 = vsel %vm1288_vm2, %v1286_v56, %v1283_v17  ;;  %v2015_v4 = vand.u32 2147483647, %v3993_v25  ;;  %v1808_v16 = vsub.f32 %v1776_v45, %v1792_v0  ;;  %vm4061_vm3 = vcmp.lt.f32.partialorder %v2006_v50, 0.0004427343  ;;  %p2628_p2 = scmp.lt.s32.totalorder %s2626_s1, %s2622_s24 }
 0x416   :  { %v2619_v8 = vpop.eup %2618  ;;  %v1305_v38 = vadd.f32 %v1289_v13, %v1081_v40  ;;  %v1349_v7 = vsel %vm442_vm5, %v1320_v58, 0.0  ;;  %v2071_v62 = vsel %vm442_vm5, %v2045_v24, 0.0  ;;  %v2047_v31 = vmul.f32 %v2031_v55, %v521_v18 }
 0x417   :  { %v2002_v2 = vmul.f32 0.6931472, %v2619_v8  ;;  %v1348_v61 = vadd.f32 %v1347_v11, %v1346_v49  ;;  %v2070_v43 = vadd.f32 %v2069_v9, %v3986_v53  ;;  %v1809_v33 = vsub.f32 %v1777_v54, %v1793_v34  ;;  %p2629_p3 = por %p2628_p2, %p2627_p1 }
 0x418   :  { %v1321_v26 = vmul.f32 %v1305_v38, %v523_v59  ;;  %v2014_v41 = vmul.f32 %v3993_v25, %v2013_v60  ;;  %v2073_v28 = vsel %vm442_vm5, %v2046_v10, 0.0  ;;  %vm2016_vm4 = vcmp.lt.f32.partialorder %v2015_v4, 0.0004427343 }
 0x419   :  { %v2621_v52 = vpop.eup %2620  ;;  %v2008_v19 = vsel %vm4061_vm3, %v2005_v3, %v2002_v2  ;;  %v1350_v29 = vadd.f32 %v1349_v7, %v1348_v61  ;;  %v2072_v51 = vadd.f32 %v2071_v62, %v2070_v43  ;;  %v2075_v20 = vsel %vm442_vm5, %v2047_v31, 0.0  ;;  %p2630_p4 = pnand %p2629_p3, %p2623_p0 }
 0x41a   :  { %v2032_v39 = vadd.f32 %v2008_v19, %v1808_v16  ;;  %v2011_v22 = vmul.f32 0.6931472, %v2621_v52  ;;  %v1351_v32 = vsel %vm442_vm5, %v1321_v26, 0.0  ;;  %vm456_vm6 = vcmask 0  }
 0x41b   :  { %v1352_v53 = vadd.f32 %v1351_v32, %v1350_v29  ;;  %v2074_v36 = vadd.f32 %v2073_v28, %v2072_v51  ;;  %v420_v42 = vpop.xlane.xlu0 %419 }
 0x41c   :  { %v2048_v27 = vmul.f32 %v2032_v39, %v522_v1  ;;  %v2017_v18 = vsel %vm2016_vm4, %v2014_v41, %v2011_v22 }
 0x41d   :  { %v2033_v25 = vadd.f32 %v2017_v18, %v1809_v33  ;;  %v1353_v37 = vrot.slane %v1352_v53, 4  ;;  %v2076_v47 = vadd.f32 %v2075_v20, %v2074_v36 }
 0x41e   :  { %v2077_v14 = vsel %vm442_vm5, %v2048_v27, 0.0 }
 0x41f   :  { %v2049_v5 = vmul.f32 %v2033_v25, %v523_v59  ;;  %v1354_v57 = vadd.f32 %v1353_v37, %v1352_v53  ;;  %v2078_v23 = vadd.f32 %v2077_v14, %v2076_v47 }
 0x421   :  { %v1355_v63 = vrot.slane %v1354_v57, 2  ;;  %v2079_v9 = vsel %vm442_vm5, %v2049_v5, 0.0 }
 0x422   :  { %v2080_v46 = vadd.f32 %v2079_v9, %v2078_v23 }
 0x423   :  { %v1356_v15 = vadd.f32 %v1355_v63, %v1354_v57 }
 0x424   :  { %v2081_v45 = vrot.slane %v2080_v46, 4 }
 0x425   :  { %v1357_v30 = vrot.slane %v1356_v15, 1  ;;  %v423_v48 = vpop.xlane.xlu1 %422 }
 0x426   :  { %v2082_v1 = vadd.f32 %v2081_v45, %v2080_v46 }
 0x427   :  { %v1358_v35 = vadd.f32 %v1357_v30, %v1356_v15 }
 0x428   :  { %v2083_v49 = vrot.slane %v2082_v1, 2 }
 0x429   :  { %1359 = vst.msk [vmem:[#allocation4] sm:$0x1] %vm456_vm6, %v1358_v35 }
 0x42a   :  { %2633 = shalt.err (!%p2630_p4)
}
 0x42b   :  { %2107 = dma.vmem_to_hbm [thread:$0]  %s2105_s23, 16, %s4117_s13, [#allocation5]   ;;  %v2084_v44 = vadd.f32 %v2083_v49, %v2082_v1  ;;  %v431_v40 = vsub.f32 0.0, %v423_v48  ;;  %v435_v6 = vld [vmem:[%s4111_s7 + $0x8] sm:$0xff]  ;;  %v430_v58 = vsub.f32 0.0, %v420_v42  ;;  %v434_v0 = vld [vmem:[%s4111_s7] sm:$0xff]  ;;  %v426_v50 = vpop.xlane.xlu0 %425 }
 0x42c   :  { %s2687_s25 = smov [#allocation6]   ;;  %v432_v17 = vsub.f32 0.0, %v426_v50 }
 0x42d   :  { %s2114_s26 = sshll.u32 %s2687_s25, 4  ;;  %v2085_v21 = vrot.slane %v2084_v44, 1  ;;  %v439_v24 = vmul.f32 %v435_v6, %v431_v40  ;;  %v438_v55 = vmul.f32 %v434_v0, %v430_v58  ;;  %s2115_s26 = int_to_ptr.vmem [resolvable:$true] %s2114_s26 }
 0x42e   :  { %s2642_s13 = scalar_lea.vmem %s2115_s26, 16  ;;  %s2646_s30 = scalar_lea.vmem %s2115_s26, 32 }
 0x42f   :  { %v2086_v54 = vadd.f32 %v2085_v21, %v2084_v44  ;;  %p2643_p5 = scmp.ne.s32.totalorder %s2115_s26, %s2642_s13  ;;  %p2647_p6 = scmp.lt.s32.totalorder %s2115_s26, %s2115_s26 }
 0x430   :  { %p2648_p7 = scmp.lt.s32.totalorder %s2646_s30, %s2642_s13 }
 0x431   :  { %2087 = vst.msk [vmem:[#allocation6] sm:$0x1] %vm456_vm6, %v2086_v54 }
 0x432   :  { %p2649_p8 = por %p2648_p7, %p2647_p6 }
 0x434   :  { %p2650_p9 = pnand %p2649_p8, %p2643_p5 }
 0x436   :  { %2653 = shalt.err (!%p2650_p9)
}
 0x437   :  { %2117 = dma.vmem_to_hbm [thread:$0]  %s2115_s26, 16, %s4118_s14, [#allocation5]   ;;  %v436_v56 = vld [vmem:[%s4111_s7 + $0x10] sm:$0xff]  ;;  %v444_v11 = vsel %vm442_vm5, %v439_v24, 0.0  ;;  %v443_v34 = vsel %vm442_vm5, %v438_v55, 0.0  ;;  %v437_v59 = vld [vmem:[%s4111_s7 + $0x18] sm:$0xff]  ;;  %v429_v13 = vpop.xlane.xlu1 %428 }
 0x438   :  { %v440_v60 = vmul.f32 %v436_v56, %v432_v17  ;;  %v445_v10 = vadd.f32 %v444_v11, %v443_v34  ;;  %v433_v4 = vsub.f32 0.0, %v429_v13  ;;  %s2688_s14 = smov [#allocation2]  }
 0x439   :  { %s2094_s19 = sshll.u32 %s2688_s14, 4  ;;  %s2095_s19 = int_to_ptr.vmem [resolvable:$true] %s2094_s19 }
 0x43a   :  { %v446_v3 = vsel %vm442_vm5, %v440_v60, 0.0  ;;  %v441_v38 = vmul.f32 %v437_v59, %v433_v4  ;;  %s2662_s7 = scalar_lea.vmem %s2095_s19, 16  ;;  %s2666_s20 = scalar_lea.vmem %s2095_s19, 32 }
 0x43b   :  { %v447_v8 = vadd.f32 %v446_v3, %v445_v10  ;;  %p2663_p10 = scmp.ne.s32.totalorder %s2095_s19, %s2662_s7  ;;  %p2667_p11 = scmp.lt.s32.totalorder %s2095_s19, %s2095_s19 }
 0x43c   :  { %v448_v16 = vsel %vm442_vm5, %v441_v38, 0.0  ;;  %p2668_p12 = scmp.lt.s32.totalorder %s2666_s20, %s2662_s7 }
 0x43d   :  { %v449_v12 = vadd.f32 %v448_v16, %v447_v8 }
 0x43e   :  { %p2669_p13 = por %p2668_p12, %p2667_p11 }
 0x43f   :  { %v450_v7 = vrot.slane %v449_v12, 4 }
 0x440   :  { %p2670_p0 = pnand %p2669_p13, %p2663_p10 }
 0x441   :  { %v451_v62 = vadd.f32 %v450_v7, %v449_v12 }
 0x443   :  { %v452_v31 = vrot.slane %v451_v62, 2 }
 0x445   :  { %v453_v2 = vadd.f32 %v452_v31, %v451_v62 }
 0x447   :  { %v454_v61 = vrot.slane %v453_v2, 1 }
 0x449   :  { %v455_v43 = vadd.f32 %v454_v61, %v453_v2 }
 0x44b   :  { %457 = vst.msk [vmem:[#allocation2] sm:$0x1] %vm456_vm6, %v455_v43 }
 0x44c   :  { %2673 = shalt.err (!%p2670_p0)
}
 0x44d   :  { %2097 = dma.vmem_to_hbm [thread:$0]  %s2095_s19, 16, %s4116_s12, [#allocation3]  }
 0x44e   :  { %2682 = dma.done.wait [#allocation3], 16  }
 0x44f   :  { %2683 = vsyncadd [#allocation3], 4294967280 }
 0x450   :  { %2684 = dma.done.wait [#allocation5], 32  }
 0x451   :  { %2685 = vsyncadd [#allocation5], 4294967264 }
 0x452   :  { %2127 = vsyncpa [#allocation3], 1 }
 0x453   :  { %2128 = vsyncpa [#allocation5], 1 }

</bundles_post_ra>
